<compile_context>
chip_gen: v5e
topology: v5e:2x2
jax: 0.10.0
libtpu: 0.0.40
codegen_flags: <defaults>
</compile_context>

<pallas_src>
import functools

import jax
import jax.numpy as jnp
import numpy as np
from jax.experimental import pallas as pl
from jax.experimental.pallas import tpu as pltpu

BN_EPS = 1e-5
VMEM_LIMIT = 32 * 1024 * 1024   # explicit scoped-VMEM cap, safe on v5e/v6e/v7x


# --------------------------------------------------------------------------
# SpatialGCN kernel: a block of TB windows, each (C, L), L = stride*stride
#   kvq  = Wkvq @ x + b            (3I, L) per window   [one fused matmul]
#   St   = v q^T                   (I, I)  per window   (St = S^T, flash pattern)
#   A^T  = softmax of S over j  == normalise St over axis 1
#   AV^T = A^T @ k                 (I, L)  per window   (canonical batched matmul)
#   out  = relu( Wog @ AV^T + bog + x )   [conv_wg + bn_wg + out conv + out BN
#                                          pre-folded into (Wog, bog)]
# --------------------------------------------------------------------------
def _sgcn_kernel(x_ref, wkvq_ref, bkvq_ref, wog_ref, bog_ref, out_ref, *, inter):
    I = inter
    x = x_ref[...].astype(jnp.float32)                       # (TB, C, L)
    tb = x.shape[0]

    # fused k/v/q projection (weight broadcast across the window batch; the
    # batched dot_general form is the one validated to lower on Mosaic)
    wkvq = jnp.broadcast_to(wkvq_ref[...][None], (tb,) + wkvq_ref.shape)
    kvq = jnp.einsum("nic,ncl->nil", wkvq, x,
                     preferred_element_type=jnp.float32)     # (TB, 3I, L)
    kvq = kvq + bkvq_ref[...][None]
    k = kvq[:, 0 * I:1 * I, :]                               # (TB, I, L)
    v = kvq[:, 1 * I:2 * I, :]
    q = kvq[:, 2 * I:3 * I, :]

    # St[n, j, i] = sum_l v[n,j,l] q[n,i,l]  (= S^T); softmax of S over j is a
    # normalisation of St over axis 1.
    st = jnp.einsum("njl,nil->nji", v, q,
                    preferred_element_type=jnp.float32)      # (TB, I, I)
    st = st - jnp.max(st, axis=1, keepdims=True)
    e = jnp.exp(st)
    at = e * pl.reciprocal(jnp.sum(e, axis=1, keepdims=True), approx=True)  # A^T

    # AV^T = A^T @ k
    avt = jnp.einsum("nji,nil->njl", at, k,
                     preferred_element_type=jnp.float32)     # (TB, I, L)

    # folded conv_wg + bn_wg + out conv + out BN, then residual + relu
    wog = jnp.broadcast_to(wog_ref[...][None], (tb,) + wog_ref.shape)
    y = jnp.einsum("nci,nil->ncl", wog, avt,
                   preferred_element_type=jnp.float32)       # (TB, C, L)
    y = y + bog_ref[...][None] + x
    out_ref[...] = jnp.maximum(y, 0.0).astype(out_ref.dtype)


def _pick_window_block(n_windows, c, l, inter, vmem_budget=8 * 1024 * 1024):
    """Largest block size dividing n_windows, keeping >=2 grid steps (megacore)
    and keeping the whole per-block f32 working set under a VMEM byte budget.

    Per-window working set (f32 words):
      x/out blocks (double-buffered by the pipeline)  : 2 * 2 * c * l
      kvq intermediate + k/v/q views                  : 2 * 3 * inter * l
      AV^T + pre-relu y                               : inter * l + c * l
      S^T / A^T attention matrices                    : 2 * inter * inter
    """
    per_win_bytes = (2 * 2 * c * l
                     + 2 * 3 * inter * l
                     + inter * l + c * l
                     + 2 * inter * inter) * 4
    cap = max(1, min(512, vmem_budget // max(1, per_win_bytes)))
    for tb in range(min(n_windows, cap), 0, -1):
        if n_windows % tb == 0 and n_windows // tb >= 2:
            return tb
    return n_windows


def spatial_gcn(win, p):
    """win: (N, C, L) -> (N, C, L)."""
    N, C, L = win.shape
    I = p["wkvq"].shape[0] // 3
    TB = _pick_window_block(N, C, L, I)

    kernel = functools.partial(_sgcn_kernel, inter=I)
    return pl.pallas_call(
        kernel,
        out_shape=jax.ShapeDtypeStruct((N, C, L), win.dtype),
        grid=(N // TB,),
        in_specs=[
            pl.BlockSpec((TB, C, L), lambda n: (n, 0, 0)),
            pl.BlockSpec((3 * I, C), lambda n: (0, 0)),    # resident (constant map)
            pl.BlockSpec((3 * I, 1), lambda n: (0, 0)),
            pl.BlockSpec((C, I), lambda n: (0, 0)),
            pl.BlockSpec((C, 1), lambda n: (0, 0)),
        ],
        out_specs=pl.BlockSpec((TB, C, L), lambda n: (n, 0, 0)),
        compiler_params=pltpu.CompilerParams(
            dimension_semantics=("parallel",),
            vmem_limit_bytes=VMEM_LIMIT,
        ),
    )(win, p["wkvq"], p["bkvq"], p["wog"], p["bog"])


# --------------------------------------------------------------------------
# merge kernel: 1x1 conv over channels, tiled (batch, spatial), lane-dense tile
# --------------------------------------------------------------------------
def _merge_kernel(x_ref, w_ref, b_ref, o_ref):
    x = x_ref[0].astype(jnp.float32)                          # (C, T)
    y = jnp.dot(w_ref[...], x, preferred_element_type=jnp.float32) + b_ref[...]
    o_ref[0] = y.astype(o_ref.dtype)


def _pick_spatial_tile(hw, c, oc, vmem_budget=8 * 1024 * 1024):
    """Lane-dense spatial tile: full HW for small images, else the largest
    multiple-of-128 divisor of HW under a VMEM-derived cap."""
    if hw <= 4096:
        return hw
    per_col_bytes = 2 * (c + oc) * 4       # double-buffered in/out columns, f32
    cap = max(128, min(4096, (vmem_budget // max(1, per_col_bytes)) // 128 * 128))
    for cand in range(cap, 127, -128):
        if hw % cand == 0:
            return cand
    return hw


def merge_conv(x, w, b):
    """x: (B, C, HW), w: (OC, C), b: (OC, 1) -> (B, OC, HW)."""
    B, C, HW = x.shape
    OC = w.shape[0]
    t = _pick_spatial_tile(HW, C, OC)

    return pl.pallas_call(
        _merge_kernel,
        out_shape=jax.ShapeDtypeStruct((B, OC, HW), x.dtype),
        grid=(B, HW // t),
        in_specs=[
            pl.BlockSpec((1, C, t), lambda bi, ti: (bi, 0, ti)),
            pl.BlockSpec((OC, C), lambda bi, ti: (0, 0)),    # resident weights
            pl.BlockSpec((OC, 1), lambda bi, ti: (0, 0)),
        ],
        out_specs=pl.BlockSpec((1, OC, t), lambda bi, ti: (bi, 0, ti)),
        compiler_params=pltpu.CompilerParams(
            dimension_semantics=("parallel", "parallel"),
            vmem_limit_bytes=VMEM_LIMIT,
        ),
    )(x, w, b)


# --------------------------------------------------------------------------
# LocalContext forward (glue reshapes mirror the PyTorch view/permute exactly)
# --------------------------------------------------------------------------
def local_context_forward(x, packed, stride):
    B, C, H, W = x.shape
    s = stride
    # window partition: x.view(B,C,H//s,s,W//s,s).permute(0,1,3,2,4,5).view(-1,C,s,s)
    xw = jnp.transpose(x.reshape(B, C, H // s, s, W // s, s), (0, 1, 3, 2, 4, 5))
    windows = xw.reshape(-1, C, s * s)                       # (N, C, L)
    N = windows.shape[0]

    local = spatial_gcn(windows, packed)                     # (N, C, L)
    local = local.reshape(N, C, s, s)

    # reverse: windows.view(B,H//s,W//s,s,s,-1).permute(0,1,3,2,4,5).view(B,-1,H,W)
    Brev = N // ((H // s) * (W // s))
    xr = jnp.transpose(local.reshape(Brev, H // s, W // s, s, s, -1),
                       (0, 1, 3, 2, 4, 5))
    xr = xr.reshape(Brev, -1, H, W)

    y = merge_conv(xr.reshape(Brev, xr.shape[1], H * W), packed["wm"], packed["bm"])
    return y.reshape(Brev, -1, H, W)


# --------------------------------------------------------------------------
# Deterministic parameter init (shapes from the PyTorch __init__)
# TODO(synk): BatchNorm is implemented in inference mode (running_mean=0,
#             running_var=1); training-mode batch statistics would need a
#             cross-window reduction pass.
# --------------------------------------------------------------------------
def init_params(key, in_channel, out_channel):
    inter = in_channel // 2
    ks = jax.random.split(key, 15)

    def nrm(k, shape, scale=0.2):
        return (scale * jax.random.normal(k, shape)).astype(jnp.float32)

    def bn_affine(kg, kb, ch):
        gamma = (1.0 + 0.1 * jax.random.normal(kg, (ch, 1))).astype(jnp.float32)
        beta = (0.1 * jax.random.normal(kb, (ch, 1))).astype(jnp.float32)
        mean = jnp.zeros((ch, 1), jnp.float32)
        var = jnp.ones((ch, 1), jnp.float32)
        scale = gamma / jnp.sqrt(var + BN_EPS)
        shift = beta - mean * scale
        return scale, shift

    g_scale, g_shift = bn_affine(ks[7], ks[8], inter)          # bn_wg (BatchNorm1d)
    o_scale, o_shift = bn_affine(ks[11], ks[12], in_channel)   # out BN (BatchNorm2d)

    return dict(
        wk=nrm(ks[0], (inter, in_channel)), bk=nrm(ks[1], (inter, 1)),
        wv=nrm(ks[2], (inter, in_channel)), bv=nrm(ks[3], (inter, 1)),
        wq=nrm(ks[4], (inter, in_channel)), bq=nrm(ks[5], (inter, 1)),
        wg=nrm(ks[6], (inter, inter)),
        g_scale=g_scale, g_shift=g_shift,
        wo=nrm(ks[9], (in_channel, inter)), bo=nrm(ks[10], (in_channel, 1)),
        o_scale=o_scale, o_shift=o_shift,
        wm=nrm(ks[13], (out_channel, in_channel)), bm=nrm(ks[14], (out_channel, 1)),
    )


def pack_params(p):
    """Fold BN affines into the 1x1 convs and fuse conv_wg with the out conv.

    Exact in inference mode:
      out_conv(BN1d(conv_wg(z))) + BN2d-affine
        = (o_scale*wo) @ ((g_scale*wg) @ z + g_shift) + o_scale*bo + o_shift
        = Wog @ z + bog
    """
    wkvq = jnp.concatenate([p["wk"], p["wv"], p["wq"]], axis=0)        # (3I, C)
    bkvq = jnp.concatenate([p["bk"], p["bv"], p["bq"]], axis=0)        # (3I, 1)
    wg_f = p["g_scale"] * p["wg"]                                      # (I, I)
    wo_f = p["o_scale"] * p["wo"]                                      # (C, I)
    wog = jnp.dot(wo_f, wg_f)                                          # (C, I)
    bog = jnp.dot(wo_f, p["g_shift"]) + p["o_scale"] * p["bo"] + p["o_shift"]
    return dict(wkvq=wkvq, bkvq=bkvq, wog=wog, bog=bog,
                wm=p["wm"], bm=p["bm"])


# --------------------------------------------------------------------------
# Pure-JAX reference (mirrors the PyTorch math, unfused/unfolded) for checking
# --------------------------------------------------------------------------
def reference_forward(x, p, stride):
    B, C, H, W = x.shape
    s = stride
    xw = jnp.transpose(x.reshape(B, C, H // s, s, W // s, s), (0, 1, 3, 2, 4, 5))
    win = xw.reshape(-1, C, s * s)                                 # (N, C, L)
    k = jnp.einsum("ic,ncl->nil", p["wk"], win) + p["bk"][None]
    v = jnp.einsum("ic,ncl->nil", p["wv"], win) + p["bv"][None]
    q = jnp.einsum("ic,ncl->nil", p["wq"], win) + p["bq"][None]
    a = jax.nn.softmax(jnp.einsum("nil,njl->nij", q, v), axis=-1)
    av_t = jnp.einsum("nji,njl->nil", a, k)                        # A^T @ k
    avw = jnp.einsum("oi,nil->nol", p["wg"], av_t)
    avw = avw * p["g_scale"][None] + p["g_shift"][None]
    y = jnp.einsum("ci,nil->ncl", p["wo"], avw) + p["bo"][None]
    y = y * p["o_scale"][None] + p["o_shift"][None]
    y = jnp.maximum(y + win, 0.0)
    local = y.reshape(-1, C, s, s)
    N = local.shape[0]
    Brev = N // ((H // s) * (W // s))
    xr = jnp.transpose(local.reshape(Brev, H // s, W // s, s, s, -1),
                       (0, 1, 3, 2, 4, 5))
    xr = xr.reshape(Brev, -1, H, W)
    out = (jnp.einsum("oc,bcl->bol", p["wm"], xr.reshape(Brev, xr.shape[1], H * W))
           + p["bm"][None])
    return out.reshape(Brev, -1, H, W)


if __name__ == "__main__":
    img_size, patch_size = 16, 4            # stride = 4 -> 4x4 windows, L = 16
    in_channel, out_channel = 8, 8
    stride = img_size // patch_size

    key = jax.random.PRNGKey(0)
    kx, kp = jax.random.split(key)
    x = jax.random.normal(kx, (2, in_channel, img_size, img_size), dtype=jnp.float32)
    raw = init_params(kp, in_channel, out_channel)
    packed = pack_params(raw)

    fwd = jax.jit(lambda xx: local_context_forward(xx, packed, stride))
    out = jax.block_until_ready(fwd(x))

    assert out.shape == (2, out_channel, img_size, img_size), out.shape
    ref = reference_forward(x, raw, stride)
    # tolerance slightly relaxed vs 1e-3 because of the EUP approximate
    # reciprocal used for the softmax denominator
    np.testing.assert_allclose(np.asarray(out), np.asarray(ref), rtol=2e-3, atol=2e-3)
    print("KERNEL_OK")
</pallas_src>

<mosaic_0001>
module attributes {stable_mosaic.version = 11 : i64} {
  func.func @_sgcn_kernel(%arg0: i32, %arg1: memref<16x8x16xf32, #tpu.memory_space<vmem>>, %arg2: memref<12x8xf32, #tpu.memory_space<vmem>>, %arg3: memref<12x1xf32, #tpu.memory_space<vmem>>, %arg4: memref<8x4xf32, #tpu.memory_space<vmem>>, %arg5: memref<8x1xf32, #tpu.memory_space<vmem>>, %arg6: memref<16x8x16xf32, #tpu.memory_space<vmem>>) attributes {dimension_semantics = [#tpu.dimension_semantics<parallel>], iteration_bounds = array<i64: 2>, scalar_prefetch = 0 : i64, scratch_operands = 0 : i64, tpu.core_type = #tpu.core_type<tc>, window_params = [{transform_indices = @transform_0, window_bounds = array<i64: 16, 8, 16>}, {pipeline_mode = #tpu.pipeline_mode<synchronous>, transform_indices = @transform_1, window_bounds = array<i64: 12, 8>}, {pipeline_mode = #tpu.pipeline_mode<synchronous>, transform_indices = @transform_2, window_bounds = array<i64: 12, 1>}, {pipeline_mode = #tpu.pipeline_mode<synchronous>, transform_indices = @transform_3, window_bounds = array<i64: 8, 4>}, {pipeline_mode = #tpu.pipeline_mode<synchronous>, transform_indices = @transform_4, window_bounds = array<i64: 8, 1>}, {transform_indices = @transform_5, window_bounds = array<i64: 16, 8, 16>}]} {
    %c0 = arith.constant 0 : index
    %c0_0 = arith.constant 0 : index
    %c0_1 = arith.constant 0 : index
    %0 = vector.load %arg1[%c0, %c0_0, %c0_1] : memref<16x8x16xf32, #tpu.memory_space<vmem>>, vector<16x8x16xf32>
    %c0_2 = arith.constant 0 : index
    %c0_3 = arith.constant 0 : index
    %1 = vector.load %arg2[%c0_2, %c0_3] : memref<12x8xf32, #tpu.memory_space<vmem>>, vector<12x8xf32>
    %2 = vector.shape_cast %1 : vector<12x8xf32> to vector<1x12x8xf32>
    %3 = vector.shape_cast %2 : vector<1x12x8xf32> to vector<1x12x8xf32>
    %4 = vector.broadcast %3 : vector<1x12x8xf32> to vector<16x12x8xf32>
    "tpu.trace_start"() <{level = 10 : i32, message = "nic,ncl->nil"}> : () -> ()
    %cst = arith.constant dense<0.000000e+00> : vector<16x12x16xf32>
    %5 = tpu.matmul %4, %0, %cst {dimension_numbers = #tpu.dot_dimension_numbers<[2], [1], [1], [2], [0, 0, 0, 1, 1, 2], [0], [0]>} : vector<16x12x8xf32>, vector<16x8x16xf32>, vector<16x12x16xf32> -> vector<16x12x16xf32>
    "tpu.trace_stop"() : () -> ()
    %c0_4 = arith.constant 0 : index
    %c0_5 = arith.constant 0 : index
    %6 = vector.load %arg3[%c0_4, %c0_5] : memref<12x1xf32, #tpu.memory_space<vmem>>, vector<12x1xf32>
    %7 = vector.shape_cast %6 : vector<12x1xf32> to vector<1x12x1xf32>
    %8 = vector.broadcast %7 : vector<1x12x1xf32> to vector<16x12x16xf32>
    %9 = arith.addf %5, %8 : vector<16x12x16xf32>
    %10 = vector.extract_strided_slice %9 {offsets = [0, 0, 0], sizes = [16, 4, 16], strides = [1, 1, 1]} : vector<16x12x16xf32> to vector<16x4x16xf32>
    %11 = vector.extract_strided_slice %9 {offsets = [0, 4, 0], sizes = [16, 4, 16], strides = [1, 1, 1]} : vector<16x12x16xf32> to vector<16x4x16xf32>
    %12 = vector.extract_strided_slice %9 {offsets = [0, 8, 0], sizes = [16, 4, 16], strides = [1, 1, 1]} : vector<16x12x16xf32> to vector<16x4x16xf32>
    "tpu.trace_start"() <{level = 10 : i32, message = "njl,nil->nji"}> : () -> ()
    %cst_6 = arith.constant dense<0.000000e+00> : vector<16x4x4xf32>
    %13 = tpu.matmul %11, %12, %cst_6 {dimension_numbers = #tpu.dot_dimension_numbers<[2], [2], [1], [1], [0, 0, 0, 1, 1, 1], [0], [0]>} : vector<16x4x16xf32>, vector<16x4x16xf32>, vector<16x4x4xf32> -> vector<16x4x4xf32>
    "tpu.trace_stop"() : () -> ()
    %cst_7 = arith.constant dense<0xFF800000> : vector<16x4xf32>
    %14 = vector.multi_reduction <maximumf>, %13, %cst_7 [1] : vector<16x4x4xf32> to vector<16x4xf32>
    %15 = vector.shape_cast %14 : vector<16x4xf32> to vector<16x1x4xf32>
    %16 = vector.broadcast %15 : vector<16x1x4xf32> to vector<16x4x4xf32>
    %17 = arith.subf %13, %16 : vector<16x4x4xf32>
    %18 = math.exp %17 : vector<16x4x4xf32>
    %cst_8 = arith.constant dense<0.000000e+00> : vector<16x4xf32>
    %19 = vector.multi_reduction <add>, %18, %cst_8 [1] : vector<16x4x4xf32> to vector<16x4xf32>
    %20 = vector.shape_cast %19 : vector<16x4xf32> to vector<16x1x4xf32>
    %21 = tpu.reciprocal %20 {approx = true} : vector<16x1x4xf32> -> vector<16x1x4xf32>
    %22 = vector.broadcast %21 : vector<16x1x4xf32> to vector<16x4x4xf32>
    %23 = arith.mulf %18, %22 : vector<16x4x4xf32>
    "tpu.trace_start"() <{level = 10 : i32, message = "nji,nil->njl"}> : () -> ()
    %cst_9 = arith.constant dense<0.000000e+00> : vector<16x4x16xf32>
    %24 = tpu.matmul %23, %10, %cst_9 {dimension_numbers = #tpu.dot_dimension_numbers<[2], [1], [1], [2], [0, 0, 0, 1, 1, 2], [0], [0]>} : vector<16x4x4xf32>, vector<16x4x16xf32>, vector<16x4x16xf32> -> vector<16x4x16xf32>
    "tpu.trace_stop"() : () -> ()
    %c0_10 = arith.constant 0 : index
    %c0_11 = arith.constant 0 : index
    %25 = vector.load %arg4[%c0_10, %c0_11] : memref<8x4xf32, #tpu.memory_space<vmem>>, vector<8x4xf32>
    %26 = vector.shape_cast %25 : vector<8x4xf32> to vector<1x8x4xf32>
    %27 = vector.shape_cast %26 : vector<1x8x4xf32> to vector<1x8x4xf32>
    %28 = vector.broadcast %27 : vector<1x8x4xf32> to vector<16x8x4xf32>
    "tpu.trace_start"() <{level = 10 : i32, message = "nci,nil->ncl"}> : () -> ()
    %cst_12 = arith.constant dense<0.000000e+00> : vector<16x8x16xf32>
    %29 = tpu.matmul %28, %24, %cst_12 {dimension_numbers = #tpu.dot_dimension_numbers<[2], [1], [1], [2], [0, 0, 0, 1, 1, 2], [0], [0]>} : vector<16x8x4xf32>, vector<16x4x16xf32>, vector<16x8x16xf32> -> vector<16x8x16xf32>
    "tpu.trace_stop"() : () -> ()
    %c0_13 = arith.constant 0 : index
    %c0_14 = arith.constant 0 : index
    %30 = vector.load %arg5[%c0_13, %c0_14] : memref<8x1xf32, #tpu.memory_space<vmem>>, vector<8x1xf32>
    %31 = vector.shape_cast %30 : vector<8x1xf32> to vector<1x8x1xf32>
    %32 = vector.broadcast %31 : vector<1x8x1xf32> to vector<16x8x16xf32>
    %33 = arith.addf %29, %32 : vector<16x8x16xf32>
    %34 = arith.addf %33, %0 : vector<16x8x16xf32>
    %cst_15 = arith.constant 0.000000e+00 : f32
    %35 = vector.broadcast %cst_15 : f32 to vector<16x8x16xf32>
    %36 = arith.maximumf %34, %35 : vector<16x8x16xf32>
    %c0_16 = arith.constant 0 : index
    %c0_17 = arith.constant 0 : index
    %c0_18 = arith.constant 0 : index
    %37 = vector.load %arg6[%c0_16, %c0_17, %c0_18] : memref<16x8x16xf32, #tpu.memory_space<vmem>>, vector<16x8x16xf32>
    tpu.vector_store %arg6[%c0_16, %c0_17, %c0_18], %36 {strides = array<i32>} : memref<16x8x16xf32, #tpu.memory_space<vmem>>, vector<16x8x16xf32>,
    return
  }
  func.func @transform_0(%arg0: i32) -> (i32, i32, i32) {
    %c0_i32 = arith.constant 0 : i32
    %c0_i32_0 = arith.constant 0 : i32
    %c0_i32_1 = arith.constant 0 : i32
    return %arg0, %c0_i32, %c0_i32_0 : i32, i32, i32
  }
  func.func @transform_1(%arg0: i32) -> (i32, i32) {
    %c0_i32 = arith.constant 0 : i32
    %c0_i32_0 = arith.constant 0 : i32
    %c0_i32_1 = arith.constant 0 : i32
    return %c0_i32, %c0_i32_0 : i32, i32
  }
  func.func @transform_2(%arg0: i32) -> (i32, i32) {
    %c0_i32 = arith.constant 0 : i32
    %c0_i32_0 = arith.constant 0 : i32
    %c0_i32_1 = arith.constant 0 : i32
    return %c0_i32, %c0_i32_0 : i32, i32
  }
  func.func @transform_3(%arg0: i32) -> (i32, i32) {
    %c0_i32 = arith.constant 0 : i32
    %c0_i32_0 = arith.constant 0 : i32
    %c0_i32_1 = arith.constant 0 : i32
    return %c0_i32, %c0_i32_0 : i32, i32
  }
  func.func @transform_4(%arg0: i32) -> (i32, i32) {
    %c0_i32 = arith.constant 0 : i32
    %c0_i32_0 = arith.constant 0 : i32
    %c0_i32_1 = arith.constant 0 : i32
    return %c0_i32, %c0_i32_0 : i32, i32
  }
  func.func @transform_5(%arg0: i32) -> (i32, i32, i32) {
    %c0_i32 = arith.constant 0 : i32
    %c0_i32_0 = arith.constant 0 : i32
    %c0_i32_1 = arith.constant 0 : i32
    return %arg0, %c0_i32, %c0_i32_0 : i32, i32, i32
  }
}

module attributes {stable_mosaic.version = 11 : i64} {
  func.func @_merge_kernel(%arg0: i32, %arg1: i32, %arg2: memref<1x8x256xf32, #tpu.memory_space<vmem>>, %arg3: memref<8x8xf32, #tpu.memory_space<vmem>>, %arg4: memref<8x1xf32, #tpu.memory_space<vmem>>, %arg5: memref<1x8x256xf32, #tpu.memory_space<vmem>>) attributes {dimension_semantics = [#tpu.dimension_semantics<parallel>, #tpu.dimension_semantics<parallel>], iteration_bounds = array<i64: 2, 1>, scalar_prefetch = 0 : i64, scratch_operands = 0 : i64, tpu.core_type = #tpu.core_type<tc>, window_params = [{transform_indices = @transform_0, window_bounds = array<i64: 1, 8, 256>}, {pipeline_mode = #tpu.pipeline_mode<synchronous>, transform_indices = @transform_1, window_bounds = array<i64: 8, 8>}, {pipeline_mode = #tpu.pipeline_mode<synchronous>, transform_indices = @transform_2, window_bounds = array<i64: 8, 1>}, {transform_indices = @transform_3, window_bounds = array<i64: 1, 8, 256>}]} {
    %c0 = arith.constant 0 : index
    %c0_0 = arith.constant 0 : index
    %c0_1 = arith.constant 0 : index
    %0 = vector.load %arg2[%c0, %c0_0, %c0_1] : memref<1x8x256xf32, #tpu.memory_space<vmem>>, vector<1x8x256xf32>
    %1 = vector.shape_cast %0 : vector<1x8x256xf32> to vector<8x256xf32>
    %c0_2 = arith.constant 0 : index
    %c0_3 = arith.constant 0 : index
    %2 = vector.load %arg3[%c0_2, %c0_3] : memref<8x8xf32, #tpu.memory_space<vmem>>, vector<8x8xf32>
    %cst = arith.constant dense<0.000000e+00> : vector<8x256xf32>
    %3 = tpu.matmul %2, %1, %cst {dimension_numbers = #tpu.dot_dimension_numbers<[1], [0], [0], [1], [0, 0, 1, 1], [], []>} : vector<8x8xf32>, vector<8x256xf32>, vector<8x256xf32> -> vector<8x256xf32>
    %c0_4 = arith.constant 0 : index
    %c0_5 = arith.constant 0 : index
    %4 = vector.load %arg4[%c0_4, %c0_5] : memref<8x1xf32, #tpu.memory_space<vmem>>, vector<8x1xf32>
    %5 = vector.broadcast %4 : vector<8x1xf32> to vector<8x256xf32>
    %6 = arith.addf %3, %5 : vector<8x256xf32>
    %c0_6 = arith.constant 0 : index
    %c0_7 = arith.constant 0 : index
    %c0_8 = arith.constant 0 : index
    %7 = vector.load %arg5[%c0_6, %c0_7, %c0_8] : memref<1x8x256xf32, #tpu.memory_space<vmem>>, vector<1x8x256xf32>
    %8 = vector.shape_cast %7 : vector<1x8x256xf32> to vector<8x256xf32>
    %9 = vector.shape_cast %6 : vector<8x256xf32> to vector<1x8x256xf32>
    tpu.vector_store %arg5[%c0_6, %c0_7, %c0_8], %9 {strides = array<i32>} : memref<1x8x256xf32, #tpu.memory_space<vmem>>, vector<1x8x256xf32>,
    return
  }
  func.func @transform_0(%arg0: i32, %arg1: i32) -> (i32, i32, i32) {
    %c0_i32 = arith.constant 0 : i32
    %c0_i32_0 = arith.constant 0 : i32
    return %arg0, %c0_i32, %arg1 : i32, i32, i32
  }
  func.func @transform_1(%arg0: i32, %arg1: i32) -> (i32, i32) {
    %c0_i32 = arith.constant 0 : i32
    %c0_i32_0 = arith.constant 0 : i32
    %c0_i32_1 = arith.constant 0 : i32
    return %c0_i32, %c0_i32_0 : i32, i32
  }
  func.func @transform_2(%arg0: i32, %arg1: i32) -> (i32, i32) {
    %c0_i32 = arith.constant 0 : i32
    %c0_i32_0 = arith.constant 0 : i32
    %c0_i32_1 = arith.constant 0 : i32
    return %c0_i32, %c0_i32_0 : i32, i32
  }
  func.func @transform_3(%arg0: i32, %arg1: i32) -> (i32, i32, i32) {
    %c0_i32 = arith.constant 0 : i32
    %c0_i32_0 = arith.constant 0 : i32
    return %arg0, %c0_i32, %arg1 : i32, i32, i32
  }
}

</mosaic_0001>

<bundles_post_ra>
// kernel: _lambda_.2
= control target key start
LH: loop header
LB: loop body
LE: loop exit
PB: predicated region body
PF: predicated region fallthrough
CT: control target
= control target key end

     0   :  { %s2524_s18 = smov 0   ;;  %s3018_s0 = inlined_call_operand.vmem [shape: f32[32,8,16], index: 0, kind: input, shape index: {}]   ;;  %s3019_s1 = inlined_call_operand.vmem [shape: f32[12,8], index: 1, kind: input, shape index: {}]   ;;  %s3020_s2 = inlined_call_operand.vmem [shape: f32[12,1], index: 2, kind: input, shape index: {}]   ;;  %s3021_s3 = inlined_call_operand.vmem [shape: f32[8,4], index: 3, kind: input, shape index: {}]   ;;  %s3022_s4 = inlined_call_operand.vmem [shape: f32[8,1], index: 4, kind: input, shape index: {}]   ;;  %s3023_s5 = inlined_call_operand.vmem [shape: f32[32,8,16], index: 5, kind: output, shape index: {}]  }
   0x1 LB: > { %s2255_s19 = sadd.s32 4294967295, %s2491_s18   ;;  %p2259_p0 = scmp.ge.s32.totalorder %s2491_s18, 1  ;;  %s2491_s18 = sphi %s2524_s18, %s15_s18  }
   0x2   : > { %p188_p1 = scmp.lt.s32.totalorder %s2491_s18, 3 }
   0x4   : > { %p189_p2 = pnand %p2259_p0, %p188_p1 }
   0x5   : > { %s2260_s20 = sshll.u32 (!%p189_p2), %s2255_s19, 4 }
   0x6   : > { %192 = sbr.rel (%p189_p2) target bundleno = 671 (0x29f), region = 40  ;;  %p217_p3 = scmp.lt.s32.totalorder (!%p189_p2), %s2260_s20, 31 }
   0xb   : > { %v2493_v0 = vmov 0   ;;  %v247_v1 = vld [vmem:[%s3020_s2 + $0x8] sm:$0xf]  ;;  %s3025_s20 = smov (!%p217_p3, %s2260_s20), 31  ;;  %v2548_v2 = vld [vmem:[%s3019_s1] sm:$0xff]  ;;  %vm258_vm0 = vcmask 64512  }
   0xc   : > { %2403 = vset.pattern.permute.xlu0 %v2493_v0  ;;  %2404 = vset.pattern.permute.xlu1 %v2493_v0  ;;  %s2261_s23 = sshll.u32 %s3025_s20, 3  ;;  %v246_v11 = vld [vmem:[%s3020_s2] sm:$0xff]  ;;  %v245_v16 = vld [vmem:[%s3019_s1 + $0x8] sm:$0xf]  ;;  %vm635_vm1 = vcmask 130048   ;;  %vm1375_vm2 = vcmask 1043456  }
   0xd   : > { %255 = vperm.xlu0 %2403, %v247_v1   ;;  %s2543_s26 = scalar_lea.vmem %s3018_s0, %s2261_s23  ;;  %vm1066_vm3 = vcmask 27648   ;;  %vm1371_vm4 = vcmask 31744   ;;  %s2959_s14 = scalar_lea.vmem %s3023_s5, %s2261_s23 }
   0xe   : > { %v228_v3 = vld [vmem:[%s2543_s26] sm:$0xff]  ;;  %v229_v4 = vld [vmem:[%s2543_s26 + $0x8] sm:$0xff]  ;;  %v230_v5 = vld [vmem:[%s2543_s26 + $0x10] sm:$0xff] }
   0xf   : > { %280 = vmatpush.msra.mxu0 %v228_v3  ;;  %303 = vmatpush.msra.mxu1 %v229_v4  ;;  %v231_v6 = vld [vmem:[%s2543_s26 + $0x18] sm:$0xff]  ;;  %v234_v7 = vld [vmem:[%s2543_s26 + $0x30] sm:$0xff]  ;;  %v232_v9 = vld [vmem:[%s2543_s26 + $0x20] sm:$0xff] }
  0x10   : > { %326 = vmatpush.msra.mxu2 %v230_v5  ;;  %349 = vmatpush.msra.mxu3 %v231_v6  ;;  %v235_v8 = vld [vmem:[%s2543_s26 + $0x38] sm:$0xff]  ;;  %v233_v10 = vld [vmem:[%s2543_s26 + $0x28] sm:$0xff]  ;;  %v238_v12 = vld [vmem:[%s2543_s26 + $0x50] sm:$0xff] }
  0x11   : > { %2264 = vmatmul.msk.f32.vlgmr.msra.gmra.mxu0 %vm258_vm0, %v2548_v2  ;;  %2266 = vmatmul.msk.f32.vlgmr.msra.gmra.mxu1 %vm258_vm0, %v2548_v2  ;;  %v239_v13 = vld [vmem:[%s2543_s26 + $0x58] sm:$0xff]  ;;  %v236_v14 = vld [vmem:[%s2543_s26 + $0x40] sm:$0xff]  ;;  %v237_v15 = vld [vmem:[%s2543_s26 + $0x48] sm:$0xff] }
  0x12   : > { %2268 = vmatmul.msk.f32.vlgmr.msra.gmra.mxu2 %vm258_vm0, %v2548_v2  ;;  %2270 = vmatmul.msk.f32.vlgmr.msra.gmra.mxu3 %vm258_vm0, %v2548_v2  ;;  %v242_v17 = vld [vmem:[%s2543_s26 + $0x70] sm:$0xff]  ;;  %v243_v18 = vld [vmem:[%s2543_s26 + $0x78] sm:$0xff]  ;;  %v240_v19 = vld [vmem:[%s2543_s26 + $0x60] sm:$0xff] }
  0x13   : > { %418 = vmatpush.msrb.mxu2 %v234_v7  ;;  %441 = vmatpush.msrb.mxu3 %v235_v8  ;;  %v241_v20 = vld [vmem:[%s2543_s26 + $0x68] sm:$0xff] }
  0x14   : > { %372 = vmatpush.msrb.mxu0 %v232_v9  ;;  %395 = vmatpush.msrb.mxu1 %v233_v10 }
  0x15   : > { %250 = vperm.xlu0 %2403, %v246_v11   ;;  %510 = vmatpush.msra.mxu2 %v238_v12 }
  0x16   : > { %533 = vmatpush.msra.mxu3 %v239_v13  ;;  %464 = vmatpush.msra.mxu0 %v236_v14 }
  0x17   : > { %487 = vmatpush.msra.mxu1 %v237_v15 }
  0x19   : > { %2265 = vmatmul.msk.f32.gmra.mxu0 %vm258_vm0, %v245_v16  ;;  %2267 = vmatmul.msk.f32.gmra.mxu1 %vm258_vm0, %v245_v16 }
  0x1a   : > { %2269 = vmatmul.msk.f32.gmra.mxu2 %vm258_vm0, %v245_v16  ;;  %2271 = vmatmul.msk.f32.gmra.mxu3 %vm258_vm0, %v245_v16 }
  0x21   : > { %2272 = vmatmul.msk.f32.vlgmr.msrb.gmra.mxu0 %vm258_vm0, %v2548_v2  ;;  %2274 = vmatmul.msk.f32.vlgmr.msrb.gmra.mxu1 %vm258_vm0, %v2548_v2 }
  0x22   : > { %2276 = vmatmul.msk.f32.vlgmr.msrb.gmra.mxu2 %vm258_vm0, %v2548_v2  ;;  %2278 = vmatmul.msk.f32.vlgmr.msrb.gmra.mxu3 %vm258_vm0, %v2548_v2 }
  0x23   : > { %602 = vmatpush.msrb.mxu2 %v242_v17  ;;  %625 = vmatpush.msrb.mxu3 %v243_v18 }
  0x24   : > { %556 = vmatpush.msrb.mxu0 %v240_v19  ;;  %579 = vmatpush.msrb.mxu1 %v241_v20 }
  0x29   : > { %2273 = vmatmul.msk.f32.gmra.mxu0 %vm258_vm0, %v245_v16  ;;  %2275 = vmatmul.msk.f32.gmra.mxu1 %vm258_vm0, %v245_v16 }
  0x2a   : > { %2277 = vmatmul.msk.f32.gmra.mxu2 %vm258_vm0, %v245_v16  ;;  %2279 = vmatmul.msk.f32.gmra.mxu3 %vm258_vm0, %v245_v16 }
  0x31   : > { %2280 = vmatmul.msk.f32.vlgmr.msra.gmra.mxu0 %vm258_vm0, %v2548_v2  ;;  %2282 = vmatmul.msk.f32.vlgmr.msra.gmra.mxu1 %vm258_vm0, %v2548_v2 }
  0x32   : > { %2284 = vmatmul.msk.f32.vlgmr.msra.gmra.mxu2 %vm258_vm0, %v2548_v2  ;;  %2286 = vmatmul.msk.f32.vlgmr.msra.gmra.mxu3 %vm258_vm0, %v2548_v2 }
  0x39   : > { %2281 = vmatmul.msk.f32.gmra.mxu0 %vm258_vm0, %v245_v16  ;;  %2283 = vmatmul.msk.f32.gmra.mxu1 %vm258_vm0, %v245_v16 }
  0x3a   : > { %2285 = vmatmul.msk.f32.gmra.mxu2 %vm258_vm0, %v245_v16  ;;  %2287 = vmatmul.msk.f32.gmra.mxu3 %vm258_vm0, %v245_v16 }
  0x41   : > { %2288 = vmatmul.msk.f32.vlgmr.msrb.gmra.mxu0 %vm258_vm0, %v2548_v2  ;;  %2290 = vmatmul.msk.f32.vlgmr.msrb.gmra.mxu1 %vm258_vm0, %v2548_v2 }
  0x42   : > { %2292 = vmatmul.msk.f32.vlgmr.msrb.gmra.mxu2 %vm258_vm0, %v2548_v2  ;;  %2294 = vmatmul.msk.f32.vlgmr.msrb.gmra.mxu3 %vm258_vm0, %v2548_v2 }
  0x49   : > { %2289 = vmatmul.msk.f32.gmra.mxu0 %vm258_vm0, %v245_v16  ;;  %2291 = vmatmul.msk.f32.gmra.mxu1 %vm258_vm0, %v245_v16 }
  0x4a   : > { %2293 = vmatmul.msk.f32.gmra.mxu2 %vm258_vm0, %v245_v16  ;;  %2295 = vmatmul.msk.f32.gmra.mxu3 %vm258_vm0, %v245_v16 }
  0x7f   : > { %v2620_v21 = vpop.permute.xlu0 %255 }
  0x87   : > { %v2622_v24 = vpop.permute.xlu0 %250 }
  0x8e   : > { %v282_v22 = vpop.f32.mrf.mxu0  ;;  %v305_v23 = vpop.f32.mrf.mxu1 }
  0x8f   : > { %v2625_v25 = vadd.f32 %v282_v22, %v2622_v24  ;;  %v2628_v26 = vadd.f32 %v305_v23, %v2622_v24 }
  0x91   : > { %v634_v33 = vrot.slane %v2625_v25, 4  ;;  %v662_v34 = vrot.slane %v2628_v26, 4 }
  0x95   : > { %v328_v27 = vpop.f32.mrf.mxu2  ;;  %v351_v28 = vpop.f32.mrf.mxu3 }
  0x96   : > { %v285_v29 = vpop.f32.mrf.mxu0  ;;  %v308_v30 = vpop.f32.mrf.mxu1  ;;  %v2639_v35 = vadd.f32 %v328_v27, %v2622_v24  ;;  %v2642_v36 = vadd.f32 %v351_v28, %v2622_v24 }
  0x97   : > { %v286_v31 = vadd.f32 %v285_v29, %v2620_v21  ;;  %v309_v32 = vadd.f32 %v308_v30, %v2620_v21 }
  0x98   : > { %v689_v43 = vrot.slane %v2639_v35, 4  ;;  %v716_v44 = vrot.slane %v2642_v36, 4 }
  0x99   : > { %2296 = vmatpush.xpose.msk.msra.mxu0 %vm635_vm1, %v286_v31  ;;  %2298 = vmatpush.xpose.msk.msra.mxu1 %vm635_vm1, %v309_v32 }
  0x9c   : > { %2297 = vmatmul.msk.f32.vlgmr.msra.gmra.mxu0 %vm635_vm1, %v634_v33  ;;  %2299 = vmatmul.msk.f32.vlgmr.msra.gmra.mxu1 %vm635_vm1, %v662_v34 }
  0x9d   : > { %v331_v37 = vpop.f32.mrf.mxu2  ;;  %v354_v38 = vpop.f32.mrf.mxu3 }
  0x9e   : > { %v332_v39 = vadd.f32 %v331_v37, %v2620_v21  ;;  %v355_v40 = vadd.f32 %v354_v38, %v2620_v21  ;;  %v374_v41 = vpop.f32.mrf.mxu0  ;;  %v397_v42 = vpop.f32.mrf.mxu1 }
  0x9f   : > { %v2653_v45 = vadd.f32 %v374_v41, %v2622_v24  ;;  %v2656_v46 = vadd.f32 %v397_v42, %v2622_v24 }
  0xa0   : > { %2300 = vmatpush.xpose.msk.msra.mxu2 %vm635_vm1, %v332_v39  ;;  %2302 = vmatpush.xpose.msk.msra.mxu3 %vm635_vm1, %v355_v40 }
  0xa1   : > { %v743_v53 = vrot.slane %v2653_v45, 4  ;;  %v770_v54 = vrot.slane %v2656_v46, 4 }
  0xa3   : > { %2301 = vmatmul.msk.f32.vlgmr.msra.gmra.mxu2 %vm635_vm1, %v689_v43  ;;  %2303 = vmatmul.msk.f32.vlgmr.msra.gmra.mxu3 %vm635_vm1, %v716_v44 }
  0xa5   : > { %v420_v47 = vpop.f32.mrf.mxu2  ;;  %v443_v48 = vpop.f32.mrf.mxu3 }
  0xa6   : > { %v377_v49 = vpop.f32.mrf.mxu0  ;;  %v400_v50 = vpop.f32.mrf.mxu1  ;;  %v2667_v55 = vadd.f32 %v420_v47, %v2622_v24  ;;  %v2670_v56 = vadd.f32 %v443_v48, %v2622_v24 }
  0xa7   : > { %v378_v51 = vadd.f32 %v377_v49, %v2620_v21  ;;  %v401_v52 = vadd.f32 %v400_v50, %v2620_v21 }
  0xa8   : > { %v797_v63 = vrot.slane %v2667_v55, 4  ;;  %v824_v0 = vrot.slane %v2670_v56, 4 }
  0xa9   : > { %2304 = vmatpush.xpose.msk.msrb.mxu0 %vm635_vm1, %v378_v51  ;;  %2306 = vmatpush.xpose.msk.msrb.mxu1 %vm635_vm1, %v401_v52 }
  0xac   : > { %2305 = vmatmul.msk.f32.vlgmr.msrb.gmra.mxu0 %vm635_vm1, %v743_v53  ;;  %2307 = vmatmul.msk.f32.vlgmr.msrb.gmra.mxu1 %vm635_vm1, %v770_v54 }
  0xad   : > { %v423_v57 = vpop.f32.mrf.mxu2  ;;  %v446_v58 = vpop.f32.mrf.mxu3 }
  0xae   : > { %v424_v59 = vadd.f32 %v423_v57, %v2620_v21  ;;  %v447_v60 = vadd.f32 %v446_v58, %v2620_v21  ;;  %v466_v61 = vpop.f32.mrf.mxu0  ;;  %v489_v62 = vpop.f32.mrf.mxu1 }
  0xaf   : > { %v2681_v3 = vadd.f32 %v466_v61, %v2622_v24  ;;  %v2684_v4 = vadd.f32 %v489_v62, %v2622_v24 }
  0xb0   : > { %2308 = vmatpush.xpose.msk.msrb.mxu2 %vm635_vm1, %v424_v59  ;;  %2310 = vmatpush.xpose.msk.msrb.mxu3 %vm635_vm1, %v447_v60 }
  0xb1   : > { %v851_v9 = vrot.slane %v2681_v3, 4  ;;  %v878_v10 = vrot.slane %v2684_v4, 4 }
  0xb3   : > { %2309 = vmatmul.msk.f32.vlgmr.msrb.gmra.mxu2 %vm635_vm1, %v797_v63  ;;  %2311 = vmatmul.msk.f32.vlgmr.msrb.gmra.mxu3 %vm635_vm1, %v824_v0 }
  0xb5   : > { %v512_v1 = vpop.f32.mrf.mxu2  ;;  %v535_v2 = vpop.f32.mrf.mxu3 }
  0xb6   : > { %v469_v5 = vpop.f32.mrf.mxu0  ;;  %v492_v6 = vpop.f32.mrf.mxu1  ;;  %v2695_v11 = vadd.f32 %v512_v1, %v2622_v24  ;;  %v2698_v12 = vadd.f32 %v535_v2, %v2622_v24 }
  0xb7   : > { %v470_v7 = vadd.f32 %v469_v5, %v2620_v21  ;;  %v493_v8 = vadd.f32 %v492_v6, %v2620_v21 }
  0xb8   : > { %v905_v19 = vrot.slane %v2695_v11, 4  ;;  %v932_v20 = vrot.slane %v2698_v12, 4 }
  0xb9   : > { %2312 = vmatpush.xpose.msk.msra.mxu0 %vm635_vm1, %v470_v7  ;;  %2314 = vmatpush.xpose.msk.msra.mxu1 %vm635_vm1, %v493_v8 }
  0xbc   : > { %2313 = vmatmul.msk.f32.vlgmr.msra.gmra.mxu0 %vm635_vm1, %v851_v9  ;;  %2315 = vmatmul.msk.f32.vlgmr.msra.gmra.mxu1 %vm635_vm1, %v878_v10 }
  0xbd   : > { %v515_v13 = vpop.f32.mrf.mxu2  ;;  %v538_v14 = vpop.f32.mrf.mxu3 }
  0xbe   : > { %v516_v15 = vadd.f32 %v515_v13, %v2620_v21  ;;  %v539_v16 = vadd.f32 %v538_v14, %v2620_v21  ;;  %v558_v17 = vpop.f32.mrf.mxu0  ;;  %v581_v18 = vpop.f32.mrf.mxu1 }
  0xbf   : > { %v2709_v27 = vadd.f32 %v558_v17, %v2622_v24  ;;  %v2712_v28 = vadd.f32 %v581_v18, %v2622_v24 }
  0xc0   : > { %2316 = vmatpush.xpose.msk.msra.mxu2 %vm635_vm1, %v516_v15  ;;  %2318 = vmatpush.xpose.msk.msra.mxu3 %vm635_vm1, %v539_v16 }
  0xc1   : > { %v959_v33 = vrot.slane %v2709_v27, 4  ;;  %v986_v34 = vrot.slane %v2712_v28, 4 }
  0xc3   : > { %2317 = vmatmul.msk.f32.vlgmr.msra.gmra.mxu2 %vm635_vm1, %v905_v19  ;;  %2319 = vmatmul.msk.f32.vlgmr.msra.gmra.mxu3 %vm635_vm1, %v932_v20 }
  0xc5   : > { %v604_v22 = vpop.f32.mrf.mxu2  ;;  %v627_v23 = vpop.f32.mrf.mxu3 }
  0xc6   : > { %v561_v29 = vpop.f32.mrf.mxu0  ;;  %v584_v30 = vpop.f32.mrf.mxu1  ;;  %v2727_v37 = vadd.f32 %v604_v22, %v2622_v24  ;;  %v2730_v38 = vadd.f32 %v627_v23, %v2622_v24 }
  0xc7   : > { %v562_v31 = vadd.f32 %v561_v29, %v2620_v21  ;;  %v585_v32 = vadd.f32 %v584_v30, %v2620_v21 }
  0xc8   : > { %v1013_v41 = vrot.slane %v2727_v37, 4  ;;  %v1040_v24 = vrot.slane %v2730_v38, 4 }
  0xc9   : > { %2320 = vmatpush.xpose.msk.msrb.mxu0 %vm635_vm1, %v562_v31  ;;  %2322 = vmatpush.xpose.msk.msrb.mxu1 %vm635_vm1, %v585_v32 }
  0xcc   : > { %2321 = vmatmul.msk.f32.vlgmr.msrb.gmra.mxu0 %vm635_vm1, %v959_v33  ;;  %2323 = vmatmul.msk.f32.vlgmr.msrb.gmra.mxu1 %vm635_vm1, %v986_v34 }
  0xcd   : > { %2328 = vmatpush.msk.msra.mxu0 %vm1375_vm2, %v2625_v25  ;;  %2330 = vmatpush.msk.msra.mxu1 %vm1375_vm2, %v2628_v26  ;;  %v607_v39 = vpop.f32.mrf.mxu2  ;;  %v630_v40 = vpop.f32.mrf.mxu3 }
  0xce   : > { %v608_v25 = vadd.f32 %v607_v39, %v2620_v21  ;;  %v631_v26 = vadd.f32 %v630_v40, %v2620_v21 }
  0xcf   : > { %2336 = vmatpush.msk.msrb.mxu0 %vm1375_vm2, %v2653_v45  ;;  %2338 = vmatpush.msk.msrb.mxu1 %vm1375_vm2, %v2656_v46 }
  0xd0   : > { %2324 = vmatpush.xpose.msk.msrb.mxu2 %vm635_vm1, %v608_v25  ;;  %2326 = vmatpush.xpose.msk.msrb.mxu3 %vm635_vm1, %v631_v26 }
  0xd3   : > { %2325 = vmatmul.msk.f32.vlgmr.msrb.gmra.mxu2 %vm635_vm1, %v1013_v41  ;;  %2327 = vmatmul.msk.f32.vlgmr.msrb.gmra.mxu3 %vm635_vm1, %v1040_v24 }
  0xd4   : > { %2332 = vmatpush.msk.msra.mxu2 %vm1375_vm2, %v2639_v35  ;;  %2334 = vmatpush.msk.msra.mxu3 %vm1375_vm2, %v2642_v36 }
  0xd6   : > { %2340 = vmatpush.msk.msrb.mxu2 %vm1375_vm2, %v2667_v55  ;;  %2342 = vmatpush.msk.msrb.mxu3 %vm1375_vm2, %v2670_v56 }
 0x119   : > { %v658_v21 = vpop.f32.mrf.mxu0  ;;  %v685_v42 = vpop.f32.mrf.mxu1 }
 0x11a   : > { %v1067_v43 = vsel %vm1066_vm3, %v658_v21, -inf  ;;  %v1074_v35 = vsel %vm1066_vm3, %v685_v42, -inf }
 0x11b   : > { %v1068_v44 = vrot.slane %v1067_v43, 4  ;;  %v1075_v45 = vrot.slane %v1074_v35, 4 }
 0x11d   : > { %v1069_v36 = vmax.f32 %v1067_v43, %v1068_v44  ;;  %v1076_v46 = vmax.f32 %v1074_v35, %v1075_v45 }
 0x11f   : > { %v1070_v47 = vrot.slane %v1069_v36, 2  ;;  %v1077_v48 = vrot.slane %v1076_v46, 2 }
 0x121   : > { %v1071_v49 = vmax.f32 %v1069_v36, %v1070_v47  ;;  %v1078_v50 = vmax.f32 %v1076_v46, %v1077_v48 }
 0x123   : > { %v1072_v51 = vrot.slane %v1071_v49, 1  ;;  %v1079_v52 = vrot.slane %v1078_v50, 1 }
 0x125   : > { %v1073_v53 = vmax.f32 %v1071_v49, %v1072_v51  ;;  %v1080_v54 = vmax.f32 %v1078_v50, %v1079_v52 }
 0x126   : > { %v712_v55 = vpop.f32.mrf.mxu2  ;;  %v739_v56 = vpop.f32.mrf.mxu3 }
 0x127   : > { %v1179_v57 = vsub.f32 %v658_v21, %v1073_v53  ;;  %v1180_v58 = vsub.f32 %v685_v42, %v1080_v54  ;;  %v1081_v59 = vsel %vm1066_vm3, %v712_v55, -inf  ;;  %v1088_v60 = vsel %vm1066_vm3, %v739_v56, -inf }
 0x128   : > { %v1082_v61 = vrot.slane %v1081_v59, 4  ;;  %v1089_v62 = vrot.slane %v1088_v60, 4 }
 0x129   : > { %v1195_v63 = vmul.f32 1.442695, %v1179_v57  ;;  %v1197_v0 = vmul.f32 1.442695, %v1180_v58  ;;  %v766_v1 = vpop.f32.mrf.mxu0  ;;  %v793_v2 = vpop.f32.mrf.mxu1 }
 0x12a   : > { %v1083_v5 = vmax.f32 %v1081_v59, %v1082_v61  ;;  %v1090_v6 = vmax.f32 %v1088_v60, %v1089_v62  ;;  %v1095_v7 = vsel %vm1066_vm3, %v766_v1, -inf  ;;  %v1102_v8 = vsel %vm1066_vm3, %v793_v2, -inf }
 0x12b   : > { %2405 = vpow2.f32 %v1195_v63  ;;  %v1096_v9 = vrot.slane %v1095_v7, 4  ;;  %v1103_v10 = vrot.slane %v1102_v8, 4 }
 0x12c   : > { %2407 = vpow2.f32 %v1197_v0  ;;  %v1084_v13 = vrot.slane %v1083_v5, 2  ;;  %v1091_v14 = vrot.slane %v1090_v6, 2 }
 0x12d   : > { %v1097_v15 = vmax.f32 %v1095_v7, %v1096_v9  ;;  %v1104_v16 = vmax.f32 %v1102_v8, %v1103_v10 }
 0x12e   : > { %v1085_v17 = vmax.f32 %v1083_v5, %v1084_v13  ;;  %v1092_v18 = vmax.f32 %v1090_v6, %v1091_v14 }
 0x12f   : > { %v1098_v19 = vrot.slane %v1097_v15, 2  ;;  %v1105_v20 = vrot.slane %v1104_v16, 2 }
 0x130   : > { %v1086_v22 = vrot.slane %v1085_v17, 1  ;;  %v1093_v23 = vrot.slane %v1092_v18, 1 }
 0x131   : > { %v2758_v29 = vpop.eup %2405  ;;  %v1099_v30 = vmax.f32 %v1097_v15, %v1098_v19  ;;  %v1106_v31 = vmax.f32 %v1104_v16, %v1105_v20 }
 0x132   : > { %v2760_v32 = vpop.eup %2407  ;;  %v1227_v33 = vsel %vm1066_vm3, %v2758_v29, 0.0  ;;  %v1087_v34 = vmax.f32 %v1085_v17, %v1086_v22  ;;  %v1094_v39 = vmax.f32 %v1092_v18, %v1093_v23 }
 0x133   : > { %v1228_v40 = vrot.slane %v1227_v33, 4  ;;  %v1234_v25 = vsel %vm1066_vm3, %v2760_v32, 0.0  ;;  %v1100_v26 = vrot.slane %v1099_v30, 1  ;;  %v1107_v41 = vrot.slane %v1106_v31, 1 }
 0x134   : > { %v1235_v24 = vrot.slane %v1234_v25, 4  ;;  %v1181_v21 = vsub.f32 %v712_v55, %v1087_v34  ;;  %v1182_v42 = vsub.f32 %v739_v56, %v1094_v39 }
 0x135   : > { %v1229_v43 = vadd.f32 %v1228_v40, %v1227_v33  ;;  %v1101_v35 = vmax.f32 %v1099_v30, %v1100_v26  ;;  %v1108_v44 = vmax.f32 %v1106_v31, %v1107_v41 }
 0x136   : > { %v1236_v45 = vadd.f32 %v1235_v24, %v1234_v25  ;;  %v1199_v36 = vmul.f32 1.442695, %v1181_v21  ;;  %v1201_v46 = vmul.f32 1.442695, %v1182_v42  ;;  %v2766_v47 = vpop.f32.mrf.mxu2  ;;  %v2768_v48 = vpop.f32.mrf.mxu3 }
 0x137   : > { %v1230_v49 = vrot.slane %v1229_v43, 2  ;;  %v1183_v50 = vsub.f32 %v766_v1, %v1101_v35  ;;  %v1184_v51 = vsub.f32 %v793_v2, %v1108_v44  ;;  %v1109_v52 = vsel %vm1066_vm3, %v2766_v47, -inf }
 0x138   : > { %v1237_v53 = vrot.slane %v1236_v45, 2  ;;  %2409 = vpow2.f32 %v1199_v36  ;;  %v1110_v54 = vrot.slane %v1109_v52, 4  ;;  %v1116_v55 = vsel %vm1066_vm3, %v2768_v48, -inf }
 0x139   : > { %v1231_v56 = vadd.f32 %v1230_v49, %v1229_v43  ;;  %2411 = vpow2.f32 %v1201_v46  ;;  %v1203_v57 = vmul.f32 1.442695, %v1183_v50  ;;  %v1205_v58 = vmul.f32 1.442695, %v1184_v51  ;;  %v2774_v59 = vpop.f32.mrf.mxu0  ;;  %v2776_v60 = vpop.f32.mrf.mxu1 }
 0x13a   : > { %v1238_v61 = vadd.f32 %v1237_v53, %v1236_v45  ;;  %v1111_v62 = vmax.f32 %v1109_v52, %v1110_v54  ;;  %v1117_v63 = vrot.slane %v1116_v55, 4  ;;  %v1123_v0 = vsel %vm1066_vm3, %v2774_v59, -inf }
 0x13b   : > { %v1232_v1 = vrot.slane %v1231_v56, 1  ;;  %2413 = vpow2.f32 %v1203_v57  ;;  %v1124_v2 = vrot.slane %v1123_v0, 4  ;;  %v1130_v5 = vsel %vm1066_vm3, %v2776_v60, -inf }
 0x13c   : > { %v1239_v6 = vrot.slane %v1238_v61, 1  ;;  %2415 = vpow2.f32 %v1205_v58  ;;  %v1112_v7 = vrot.slane %v1111_v62, 2  ;;  %v1118_v8 = vmax.f32 %v1116_v55, %v1117_v63 }
 0x13d   : > { %v1233_v9 = vadd.f32 %v1232_v1, %v1231_v56  ;;  %v1125_v10 = vmax.f32 %v1123_v0, %v1124_v2  ;;  %v1131_v13 = vrot.slane %v1130_v5, 4 }
 0x13e   : > { %v2782_v14 = vpop.eup %2409  ;;  %v1240_v15 = vadd.f32 %v1239_v6, %v1238_v61  ;;  %v1113_v16 = vmax.f32 %v1111_v62, %v1112_v7  ;;  %v1119_v17 = vrot.slane %v1118_v8, 2 }
 0x13f   : > { %v2784_v18 = vpop.eup %2411  ;;  %2417 = vrcp.f32 %v1233_v9  ;;  %v1241_v19 = vsel %vm1066_vm3, %v2782_v14, 0.0  ;;  %v1126_v20 = vrot.slane %v1125_v10, 2  ;;  %v1132_v22 = vmax.f32 %v1130_v5, %v1131_v13 }
 0x140   : > { %2419 = vrcp.f32 %v1240_v15  ;;  %v1242_v23 = vrot.slane %v1241_v19, 4  ;;  %v1248_v30 = vsel %vm1066_vm3, %v2784_v18, 0.0  ;;  %v1114_v31 = vrot.slane %v1113_v16, 1 }
 0x141   : > { %v2790_v33 = vpop.eup %2413  ;;  %v1249_v34 = vrot.slane %v1248_v30, 4  ;;  %v1120_v39 = vmax.f32 %v1118_v8, %v1119_v17  ;;  %v1127_v40 = vmax.f32 %v1125_v10, %v1126_v20  ;;  %v1133_v25 = vrot.slane %v1132_v22, 2 }
 0x142   : > { %v2792_v26 = vpop.eup %2415  ;;  %v1243_v41 = vadd.f32 %v1242_v23, %v1241_v19  ;;  %v1255_v24 = vsel %vm1066_vm3, %v2790_v33, 0.0  ;;  %v1115_v21 = vmax.f32 %v1113_v16, %v1114_v31 }
 0x143   : > { %v1250_v42 = vadd.f32 %v1249_v34, %v1248_v30  ;;  %v1256_v43 = vrot.slane %v1255_v24, 4  ;;  %v1262_v35 = vsel %vm1066_vm3, %v2792_v26, 0.0  ;;  %v1121_v44 = vrot.slane %v1120_v39, 1 }
 0x144   : > { %v1244_v45 = vrot.slane %v1243_v41, 2  ;;  %v1263_v36 = vrot.slane %v1262_v35, 4  ;;  %v1185_v46 = vsub.f32 %v2766_v47, %v1115_v21  ;;  %v1128_v49 = vrot.slane %v1127_v40, 1 }
 0x145   : > { %v2418_v50 = vpop.eup %2417  ;;  %v1251_v51 = vrot.slane %v1250_v42, 2  ;;  %v1257_v52 = vadd.f32 %v1256_v43, %v1255_v24  ;;  %v1122_v53 = vmax.f32 %v1120_v39, %v1121_v44  ;;  %v1134_v54 = vmax.f32 %v1132_v22, %v1133_v25 }
 0x146   : > { %v2420_v55 = vpop.eup %2419  ;;  %v1355_v56 = vmul.f32 %v2418_v50, %v2758_v29  ;;  %v1245_v57 = vadd.f32 %v1244_v45, %v1243_v41  ;;  %v1264_v58 = vadd.f32 %v1263_v36, %v1262_v35  ;;  %v1207_v61 = vmul.f32 1.442695, %v1185_v46  ;;  %v2802_v2 = vpop.f32.mrf.mxu2 }
 0x147   : > { %v1356_v62 = vmul.f32 %v2420_v55, %v2760_v32  ;;  %v1252_v63 = vadd.f32 %v1251_v51, %v1250_v42  ;;  %v1258_v0 = vrot.slane %v1257_v52, 2  ;;  %v1186_v1 = vsub.f32 %v2768_v48, %v1122_v53  ;;  %v2811_v15 = vpop.f32.mrf.mxu3 }
 0x148   : > { %v1246_v47 = vrot.slane %v1245_v57, 1  ;;  %v1265_v5 = vrot.slane %v1264_v58, 2  ;;  %2421 = vpow2.f32 %v1207_v61  ;;  %v1129_v6 = vmax.f32 %v1127_v40, %v1128_v49  ;;  %2329 = vmatmul.msk.f32.vlgmr.msra.gmra.mxu0 %vm1371_vm4, %v1355_v56 }
 0x149   : > { %v1253_v7 = vrot.slane %v1252_v63, 1  ;;  %v1259_v8 = vadd.f32 %v1258_v0, %v1257_v52  ;;  %v1209_v29 = vmul.f32 1.442695, %v1186_v1  ;;  %v1135_v9 = vrot.slane %v1134_v54, 1  ;;  %2331 = vmatmul.msk.f32.vlgmr.msra.gmra.mxu1 %vm1371_vm4, %v1356_v62  ;;  %2344 = vmatpush.msk.msra.mxu0 %vm1375_vm2, %v2681_v3  ;;  %v2815_v23 = vpop.f32.mrf.mxu0  ;;  %v2822_v25 = vpop.f32.mrf.mxu1 }
 0x14a   : > { %v1247_v32 = vadd.f32 %v1246_v47, %v1245_v57  ;;  %v1266_v10 = vadd.f32 %v1265_v5, %v1264_v58  ;;  %v1187_v48 = vsub.f32 %v2774_v59, %v1129_v6  ;;  %v1137_v13 = vsel %vm1066_vm3, %v2802_v2, -inf  ;;  %2346 = vmatpush.msk.msra.mxu1 %vm1375_vm2, %v2684_v4 }
 0x14b   : > { %v1254_v16 = vadd.f32 %v1253_v7, %v1252_v63  ;;  %v1260_v17 = vrot.slane %v1259_v8, 1  ;;  %2423 = vpow2.f32 %v1209_v29  ;;  %v1136_v19 = vmax.f32 %v1134_v54, %v1135_v9 }
 0x14c   : > { %2425 = vrcp.f32 %v1247_v32  ;;  %v1267_v20 = vrot.slane %v1266_v10, 1  ;;  %v1211_v22 = vmul.f32 1.442695, %v1187_v48  ;;  %v1138_v3 = vrot.slane %v1137_v13, 4 }
 0x14d   : > { %2427 = vrcp.f32 %v1254_v16  ;;  %v1261_v59 = vadd.f32 %v1260_v17, %v1259_v8  ;;  %v1188_v30 = vsub.f32 %v2776_v60, %v1136_v19  ;;  %v1144_v31 = vsel %vm1066_vm3, %v2811_v15, -inf }
 0x14e   : > { %v2820_v34 = vpop.eup %2421  ;;  %v1268_v4 = vadd.f32 %v1267_v20, %v1266_v10  ;;  %2429 = vpow2.f32 %v1211_v22  ;;  %v1139_v39 = vmax.f32 %v1137_v13, %v1138_v3  ;;  %v1145_v40 = vrot.slane %v1144_v31, 4 }
 0x14f   : > { %2431 = vrcp.f32 %v1261_v59  ;;  %v1269_v41 = vsel %vm1066_vm3, %v2820_v34, 0.0  ;;  %v1213_v24 = vmul.f32 1.442695, %v1188_v30  ;;  %v1151_v21 = vsel %vm1066_vm3, %v2815_v23, -inf }
 0x150   : > { %2433 = vrcp.f32 %v1268_v4  ;;  %v1270_v60 = vrot.slane %v1269_v41, 4  ;;  %v1140_v42 = vrot.slane %v1139_v39, 2  ;;  %v1146_v43 = vmax.f32 %v1144_v31, %v1145_v40 }
 0x151   : > { %v2828_v35 = vpop.eup %2423  ;;  %2435 = vpow2.f32 %v1213_v24  ;;  %v1152_v44 = vrot.slane %v1151_v21, 4  ;;  %v1158_v45 = vsel %vm1066_vm3, %v2822_v25, -inf }
 0x152   : > { %v2426_v36 = vpop.eup %2425  ;;  %v1271_v46 = vadd.f32 %v1270_v60, %v1269_v41  ;;  %v1276_v49 = vsel %vm1066_vm3, %v2828_v35, 0.0  ;;  %v1141_v50 = vmax.f32 %v1139_v39, %v1140_v42  ;;  %v1147_v51 = vrot.slane %v1146_v43, 2 }
 0x153   : > { %v2428_v52 = vpop.eup %2427  ;;  %v1357_v53 = vmul.f32 %v2426_v36, %v2782_v14  ;;  %v1277_v54 = vrot.slane %v1276_v49, 4  ;;  %v1153_v55 = vmax.f32 %v1151_v21, %v1152_v44  ;;  %v1159_v56 = vrot.slane %v1158_v45, 4 }
 0x154   : > { %v2835_v57 = vpop.eup %2429  ;;  %v1358_v58 = vmul.f32 %v2428_v52, %v2784_v18  ;;  %v1272_v61 = vrot.slane %v1271_v46, 2  ;;  %v1142_v62 = vrot.slane %v1141_v50, 1  ;;  %v1148_v63 = vmax.f32 %v1146_v43, %v1147_v51 }
 0x155   : > { %v2432_v0 = vpop.eup %2431  ;;  %v1278_v1 = vadd.f32 %v1277_v54, %v1276_v49  ;;  %v1283_v47 = vsel %vm1066_vm3, %v2835_v57, 0.0  ;;  %v1154_v5 = vrot.slane %v1153_v55, 2  ;;  %v1160_v6 = vmax.f32 %v1158_v45, %v1159_v56  ;;  %2333 = vmatmul.msk.f32.vlgmr.msra.gmra.mxu2 %vm1371_vm4, %v1357_v53 }
 0x156   : > { %v2434_v14 = vpop.eup %2433  ;;  %v1359_v7 = vmul.f32 %v2432_v0, %v2790_v33  ;;  %v1273_v8 = vadd.f32 %v1272_v61, %v1271_v46  ;;  %v1284_v29 = vrot.slane %v1283_v47, 4  ;;  %v1143_v9 = vmax.f32 %v1141_v50, %v1142_v62  ;;  %2335 = vmatmul.msk.f32.vlgmr.msra.gmra.mxu3 %vm1371_vm4, %v1358_v58  ;;  %2348 = vmatpush.msk.msra.mxu2 %vm1375_vm2, %v2695_v11  ;;  %v2864_v60 = vpop.f32.mrf.mxu3 }
 0x157   : > { %v2845_v18 = vpop.eup %2435  ;;  %v1360_v32 = vmul.f32 %v2434_v14, %v2792_v26  ;;  %v1279_v10 = vrot.slane %v1278_v1, 2  ;;  %v1149_v48 = vrot.slane %v1148_v63, 1  ;;  %v1155_v13 = vmax.f32 %v1153_v55, %v1154_v5  ;;  %2350 = vmatpush.msk.msra.mxu3 %vm1375_vm2, %v2698_v12  ;;  %v2854_v26 = vpop.f32.mrf.mxu2 }
 0x158   : > { %v1274_v16 = vrot.slane %v1273_v8, 1  ;;  %v1285_v33 = vadd.f32 %v1284_v29, %v1283_v47  ;;  %v1290_v17 = vsel %vm1066_vm3, %v2845_v18, 0.0  ;;  %v1189_v19 = vsub.f32 %v2802_v2, %v1143_v9  ;;  %2337 = vmatmul.msk.f32.vlgmr.msrb.gmra.mxu0 %vm1371_vm4, %v1359_v7 }
 0x159   : > { %v1280_v11 = vadd.f32 %v1279_v10, %v1278_v1  ;;  %v1291_v20 = vrot.slane %v1290_v17, 4  ;;  %v1150_v22 = vmax.f32 %v1148_v63, %v1149_v48  ;;  %v1156_v3 = vrot.slane %v1155_v13, 1  ;;  %2339 = vmatmul.msk.f32.vlgmr.msrb.gmra.mxu1 %vm1371_vm4, %v1360_v32  ;;  %2352 = vmatpush.msk.msrb.mxu0 %vm1375_vm2, %v2709_v27 }
 0x15a   : > { %v1275_v12 = vadd.f32 %v1274_v16, %v1273_v8  ;;  %v1286_v59 = vrot.slane %v1285_v33, 2  ;;  %v1215_v30 = vmul.f32 1.442695, %v1189_v19  ;;  %v1161_v31 = vrot.slane %v1160_v6, 2  ;;  %2354 = vmatpush.msk.msrb.mxu1 %vm1375_vm2, %v2712_v28 }
 0x15b   : > { %v1281_v2 = vrot.slane %v1280_v11, 1  ;;  %v1292_v4 = vadd.f32 %v1291_v20, %v1290_v17  ;;  %v1190_v39 = vsub.f32 %v2811_v15, %v1150_v22  ;;  %v1157_v40 = vmax.f32 %v1155_v13, %v1156_v3 }
 0x15c   : > { %2437 = vrcp.f32 %v1275_v12  ;;  %v1287_v41 = vadd.f32 %v1286_v59, %v1285_v33  ;;  %v1162_v24 = vmax.f32 %v1160_v6, %v1161_v31  ;;  %v1165_v21 = vsel %vm1066_vm3, %v2854_v26, -inf }
 0x15d   : > { %v1282_v27 = vadd.f32 %v1281_v2, %v1280_v11  ;;  %v1293_v42 = vrot.slane %v1292_v4, 2  ;;  %2439 = vpow2.f32 %v1215_v30  ;;  %v1217_v43 = vmul.f32 1.442695, %v1190_v39 }
 0x15e   : > { %v1288_v44 = vrot.slane %v1287_v41, 1  ;;  %v1191_v28 = vsub.f32 %v2815_v23, %v1157_v40  ;;  %v1163_v45 = vrot.slane %v1162_v24, 1  ;;  %v1166_v36 = vrot.slane %v1165_v21, 4 }
 0x15f   : > { %2441 = vrcp.f32 %v1282_v27  ;;  %v1294_v15 = vadd.f32 %v1293_v42, %v1292_v4  ;;  %v1172_v46 = vsel %vm1066_vm3, %v2864_v60, -inf }
 0x160   : > { %v1289_v49 = vadd.f32 %v1288_v44, %v1287_v41  ;;  %2443 = vpow2.f32 %v1217_v43  ;;  %v1219_v50 = vmul.f32 1.442695, %v1191_v28  ;;  %v1164_v51 = vmax.f32 %v1162_v24, %v1163_v45 }
 0x161   : > { %v1295_v52 = vrot.slane %v1294_v15, 1  ;;  %v1167_v53 = vmax.f32 %v1165_v21, %v1166_v36  ;;  %v1173_v54 = vrot.slane %v1172_v46, 4 }
 0x162   : > { %v2438_v55 = vpop.eup %2437  ;;  %2445 = vrcp.f32 %v1289_v49  ;;  %v1192_v56 = vsub.f32 %v2822_v25, %v1164_v51 }
 0x163   : > { %v2870_v58 = vpop.eup %2439  ;;  %v1361_v23 = vmul.f32 %v2438_v55, %v2820_v34  ;;  %v1296_v61 = vadd.f32 %v1295_v52, %v1294_v15  ;;  %2447 = vpow2.f32 %v1219_v50  ;;  %v1168_v62 = vrot.slane %v1167_v53, 2 }
 0x164   : > { %v1297_v63 = vsel %vm1066_vm3, %v2870_v58, 0.0  ;;  %v1221_v0 = vmul.f32 1.442695, %v1192_v56  ;;  %v1174_v1 = vmax.f32 %v1172_v46, %v1173_v54 }
 0x165   : > { %v2442_v47 = vpop.eup %2441  ;;  %2449 = vrcp.f32 %v1296_v61  ;;  %v1298_v5 = vrot.slane %v1297_v63, 4  ;;  %v1169_v6 = vmax.f32 %v1167_v53, %v1168_v62  ;;  %2341 = vmatmul.msk.f32.vlgmr.msrb.gmra.mxu2 %vm1371_vm4, %v1361_v23 }
 0x166   : > { %v2876_v14 = vpop.eup %2443  ;;  %v1362_v25 = vmul.f32 %v2442_v47, %v2828_v35  ;;  %2451 = vpow2.f32 %v1221_v0  ;;  %v1175_v34 = vrot.slane %v1174_v1, 2  ;;  %2356 = vmatpush.msk.msrb.mxu2 %vm1375_vm2, %v2727_v37 }
 0x167   : > { %v1299_v7 = vadd.f32 %v1298_v5, %v1297_v63  ;;  %v1304_v8 = vsel %vm1066_vm3, %v2876_v14, 0.0  ;;  %v1170_v29 = vrot.slane %v1169_v6, 1 }
 0x168   : > { %v2446_v9 = vpop.eup %2445  ;;  %v1305_v32 = vrot.slane %v1304_v8, 4  ;;  %v1176_v10 = vmax.f32 %v1174_v1, %v1175_v34  ;;  %2343 = vmatmul.msk.f32.vlgmr.msrb.gmra.mxu3 %vm1371_vm4, %v1362_v25 }
 0x169   : > { %v2448_v48 = vpop.eup %2447  ;;  %v1363_v13 = vmul.f32 %v2446_v9, %v2835_v57  ;;  %v1300_v16 = vrot.slane %v1299_v7, 2  ;;  %v1171_v35 = vmax.f32 %v1169_v6, %v1170_v29  ;;  %2358 = vmatpush.msk.msrb.mxu3 %vm1375_vm2, %v2730_v38 }
 0x16a   : > { %v1306_v33 = vadd.f32 %v1305_v32, %v1304_v8  ;;  %v1311_v37 = vsel %vm1066_vm3, %v2448_v48, 0.0  ;;  %v1177_v17 = vrot.slane %v1176_v10, 1 }
 0x16b   : > { %v2450_v19 = vpop.eup %2449  ;;  %v1301_v11 = vadd.f32 %v1300_v16, %v1299_v7  ;;  %v1312_v20 = vrot.slane %v1311_v37, 4  ;;  %v1193_v22 = vsub.f32 %v2854_v26, %v1171_v35  ;;  %2345 = vmatmul.msk.f32.vlgmr.msra.gmra.mxu0 %vm1371_vm4, %v1363_v13  ;;  %v1773_v13 = vld [vmem:[%s3021_s3] sm:$0xff] }
 0x16c   : > { %v2452_v3 = vpop.eup %2451  ;;  %v1364_v12 = vmul.f32 %v2450_v19, %v2845_v18  ;;  %v1307_v57 = vrot.slane %v1306_v33, 2  ;;  %v1178_v59 = vmax.f32 %v1176_v10, %v1177_v17 }
 0x16d   : > { %v1302_v30 = vrot.slane %v1301_v11, 1  ;;  %v1313_v31 = vadd.f32 %v1312_v20, %v1311_v37  ;;  %v1318_v38 = vsel %vm1066_vm3, %v2452_v3, 0.0  ;;  %v1223_v2 = vmul.f32 1.442695, %v1193_v22  ;;  %v1774_v22 = vld [vmem:[%s3022_s4] sm:$0xff] }
 0x16e   : > { %v1308_v4 = vadd.f32 %v1307_v57, %v1306_v33  ;;  %v1319_v39 = vrot.slane %v1318_v38, 4  ;;  %v1194_v40 = vsub.f32 %v2864_v60, %v1178_v59  ;;  %2347 = vmatmul.msk.f32.vlgmr.msra.gmra.mxu1 %vm1371_vm4, %v1364_v12  ;;  %1777 = vperm.xlu1 %2404, %v1774_v22  }
 0x16f   : > { %v1303_v41 = vadd.f32 %v1302_v30, %v1301_v11  ;;  %v1314_v26 = vrot.slane %v1313_v31, 2  ;;  %2453 = vpow2.f32 %v1223_v2 }
 0x170   : > { %v1309_v24 = vrot.slane %v1308_v4, 1  ;;  %v1320_v21 = vadd.f32 %v1319_v39, %v1318_v38  ;;  %v1225_v27 = vmul.f32 1.442695, %v1194_v40 }
 0x171   : > { %2455 = vrcp.f32 %v1303_v41  ;;  %v1315_v18 = vadd.f32 %v1314_v26, %v1313_v31 }
 0x172   : > { %v1310_v42 = vadd.f32 %v1309_v24, %v1308_v4  ;;  %v1321_v43 = vrot.slane %v1320_v21, 2  ;;  %2457 = vpow2.f32 %v1225_v27 }
 0x173   : > { %v1316_v44 = vrot.slane %v1315_v18, 1 }
 0x174   : > { %2459 = vrcp.f32 %v1310_v42  ;;  %v1322_v28 = vadd.f32 %v1321_v43, %v1320_v21 }
 0x175   : > { %v2454_v45 = vpop.eup %2453  ;;  %v1317_v36 = vadd.f32 %v1316_v44, %v1315_v18  ;;  %v2469_v44 = vld [vmem:[%s2543_s26] sm:$0xff] }
 0x176   : > { %v1323_v15 = vrot.slane %v1322_v28, 1  ;;  %v1325_v60 = vsel %vm1066_vm3, %v2454_v45, 0.0 }
 0x177   : > { %v2456_v46 = vpop.eup %2455  ;;  %2461 = vrcp.f32 %v1317_v36  ;;  %v1326_v49 = vrot.slane %v1325_v60, 4 }
 0x178   : > { %v2458_v50 = vpop.eup %2457  ;;  %v1365_v51 = vmul.f32 %v2456_v46, %v2870_v58  ;;  %v1324_v52 = vadd.f32 %v1323_v15, %v1322_v28  ;;  %v2471_v15 = vld [vmem:[%s2543_s26 + $0x10] sm:$0xff]  ;;  %v2472_v46 = vld [vmem:[%s2543_s26 + $0x18] sm:$0xff] }
 0x179   : > { %v1327_v53 = vadd.f32 %v1326_v49, %v1325_v60  ;;  %v1332_v54 = vsel %vm1066_vm3, %v2458_v50, 0.0 }
 0x17a   : > { %v2460_v55 = vpop.eup %2459  ;;  %2463 = vrcp.f32 %v1324_v52  ;;  %v1333_v56 = vrot.slane %v1332_v54, 4  ;;  %2349 = vmatmul.msk.f32.vlgmr.msra.gmra.mxu2 %vm1371_vm4, %v1365_v51  ;;  %v2474_v52 = vld [vmem:[%s2543_s26 + $0x28] sm:$0xff] }
 0x17b   : > { %v1366_v23 = vmul.f32 %v2460_v55, %v2876_v14  ;;  %v1328_v61 = vrot.slane %v1327_v53, 2 }
 0x17c   : > { %v1334_v62 = vadd.f32 %v1333_v56, %v1332_v54 }
 0x17d   : > { %v2462_v63 = vpop.eup %2461  ;;  %v1329_v0 = vadd.f32 %v1328_v61, %v1327_v53  ;;  %2351 = vmatmul.msk.f32.vlgmr.msra.gmra.mxu3 %vm1371_vm4, %v1366_v23 }
 0x17e   : > { %v1367_v1 = vmul.f32 %v2462_v63, %v2448_v48  ;;  %v1335_v47 = vrot.slane %v1334_v62, 2 }
 0x17f   : > { %v1330_v58 = vrot.slane %v1329_v0, 1 }
 0x180   : > { %v2464_v5 = vpop.eup %2463  ;;  %v1336_v6 = vadd.f32 %v1335_v47, %v1334_v62  ;;  %2353 = vmatmul.msk.f32.vlgmr.msrb.gmra.mxu0 %vm1371_vm4, %v1367_v1  ;;  %v2475_v1 = vld [vmem:[%s2543_s26 + $0x40] sm:$0xff] }
 0x181   : > { %v1368_v25 = vmul.f32 %v2464_v5, %v2452_v3  ;;  %v1331_v34 = vadd.f32 %v1330_v58, %v1329_v0 }
 0x182   : > { %v1337_v7 = vrot.slane %v1336_v6, 1 }
 0x183   : > { %2465 = vrcp.f32 %v1331_v34  ;;  %2355 = vmatmul.msk.f32.vlgmr.msrb.gmra.mxu1 %vm1371_vm4, %v1368_v25 }
 0x184   : > { %v1338_v14 = vadd.f32 %v1337_v7, %v1336_v6  ;;  %v2476_v7 = vld [vmem:[%s2543_s26 + $0x48] sm:$0xff] }
 0x186   : > { %2467 = vrcp.f32 %v1338_v14 }
 0x189   : > { %v2466_v8 = vpop.eup %2465 }
 0x18a   : > { %v1369_v29 = vmul.f32 %v2466_v8, %v2454_v45  ;;  %v2470_v45 = vld [vmem:[%s2543_s26 + $0x8] sm:$0xff]  ;;  %v2477_v8 = vld [vmem:[%s2543_s26 + $0x30] sm:$0xff] }
 0x18c   : > { %v2468_v9 = vpop.eup %2467  ;;  %2357 = vmatmul.msk.f32.vlgmr.msrb.gmra.mxu2 %vm1371_vm4, %v1369_v29 }
 0x18d   : > { %v1370_v32 = vmul.f32 %v2468_v9, %v2458_v50  ;;  %v2473_v50 = vld [vmem:[%s2543_s26 + $0x20] sm:$0xff] }
 0x18f   : > { %2359 = vmatmul.msk.f32.vlgmr.msrb.gmra.mxu3 %vm1371_vm4, %v1370_v32 }
 0x1c5   : > { %v1395_v10 = vpop.f32.mrf.mxu0 }
 0x1c6   : > { %v1420_v48 = vpop.f32.mrf.mxu1  ;;  %2360 = vmatpush.msk.msra.mxu0 %vm1375_vm2, %v1395_v10 }
 0x1c7   : > { %2362 = vmatpush.msk.msra.mxu1 %vm1375_vm2, %v1420_v48  ;;  %2361 = vmatmul.msk.f32.vlgmr.msra.gmra.mxu0 %vm1371_vm4, %v1773_v13 }
 0x1c8   : > { %2363 = vmatmul.msk.f32.vlgmr.msra.gmra.mxu1 %vm1371_vm4, %v1773_v13 }
 0x1d5   : > { %v1495_v16 = vpop.f32.mrf.mxu0 }
 0x1d6   : > { %v1520_v35 = vpop.f32.mrf.mxu1  ;;  %2368 = vmatpush.msk.msrb.mxu0 %vm1375_vm2, %v1495_v16 }
 0x1d7   : > { %2370 = vmatpush.msk.msrb.mxu1 %vm1375_vm2, %v1520_v35  ;;  %2369 = vmatmul.msk.f32.vlgmr.msrb.gmra.mxu0 %vm1371_vm4, %v1773_v13 }
 0x1d8   : > { %v1445_v33 = vpop.f32.mrf.mxu2  ;;  %2371 = vmatmul.msk.f32.vlgmr.msrb.gmra.mxu1 %vm1371_vm4, %v1773_v13 }
 0x1d9   : > { %v1470_v37 = vpop.f32.mrf.mxu3  ;;  %2364 = vmatpush.msk.msra.mxu2 %vm1375_vm2, %v1445_v33 }
 0x1da   : > { %2366 = vmatpush.msk.msra.mxu3 %vm1375_vm2, %v1470_v37  ;;  %2365 = vmatmul.msk.f32.vlgmr.msra.gmra.mxu2 %vm1371_vm4, %v1773_v13 }
 0x1db   : > { %2367 = vmatmul.msk.f32.vlgmr.msra.gmra.mxu3 %vm1371_vm4, %v1773_v13 }
 0x1e0   : > { %v2942_v26 = vpop.permute.xlu1 %1777 }
 0x1e8   : > { %v1595_v17 = vpop.f32.mrf.mxu0  ;;  %v1545_v19 = vpop.f32.mrf.mxu2 }
 0x1e9   : > { %2376 = vmatpush.msk.msra.mxu0 %vm1375_vm2, %v1595_v17  ;;  %2372 = vmatpush.msk.msrb.mxu2 %vm1375_vm2, %v1545_v19  ;;  %v2479_v17 = vld [vmem:[%s2543_s26 + $0x60] sm:$0xff] }
 0x1ea   : > { %2373 = vmatmul.msk.f32.vlgmr.msrb.gmra.mxu2 %vm1371_vm4, %v1773_v13  ;;  %2377 = vmatmul.msk.f32.vlgmr.msra.gmra.mxu0 %vm1371_vm4, %v1773_v13 }
 0x1eb   : > { %v1620_v11 = vpop.f32.mrf.mxu1  ;;  %v1570_v20 = vpop.f32.mrf.mxu3 }
 0x1ec   : > { %2378 = vmatpush.msk.msra.mxu1 %vm1375_vm2, %v1620_v11  ;;  %2374 = vmatpush.msk.msrb.mxu3 %vm1375_vm2, %v1570_v20 }
 0x1ed   : > { %2375 = vmatmul.msk.f32.vlgmr.msrb.gmra.mxu3 %vm1371_vm4, %v1773_v13  ;;  %2379 = vmatmul.msk.f32.vlgmr.msra.gmra.mxu1 %vm1371_vm4, %v1773_v13 }
 0x1fd   : > { %v1695_v3 = vpop.f32.mrf.mxu0  ;;  %v1645_v12 = vpop.f32.mrf.mxu2 }
 0x1fe   : > { %2384 = vmatpush.msk.msrb.mxu0 %vm1375_vm2, %v1695_v3  ;;  %2380 = vmatpush.msk.msra.mxu2 %vm1375_vm2, %v1645_v12  ;;  %v2480_v12 = vld [vmem:[%s2543_s26 + $0x68] sm:$0xff] }
 0x1ff   : > { %2381 = vmatmul.msk.f32.vlgmr.msra.gmra.mxu2 %vm1371_vm4, %v1773_v13  ;;  %2385 = vmatmul.msk.f32.vlgmr.msrb.gmra.mxu0 %vm1371_vm4, %v1773_v13 }
 0x200   : > { %v1720_v57 = vpop.f32.mrf.mxu1  ;;  %v1670_v59 = vpop.f32.mrf.mxu3 }
 0x201   : > { %2386 = vmatpush.msk.msrb.mxu1 %vm1375_vm2, %v1720_v57  ;;  %2382 = vmatpush.msk.msra.mxu3 %vm1375_vm2, %v1670_v59 }
 0x202   : > { %2383 = vmatmul.msk.f32.vlgmr.msra.gmra.mxu3 %vm1371_vm4, %v1773_v13  ;;  %2387 = vmatmul.msk.f32.vlgmr.msrb.gmra.mxu1 %vm1371_vm4, %v1773_v13 }
 0x20f   : > { %v1745_v30 = vpop.f32.mrf.mxu2 }
 0x210   : > { %2388 = vmatpush.msk.msrb.mxu2 %vm1375_vm2, %v1745_v30 }
 0x211   : > { %2389 = vmatmul.msk.f32.vlgmr.msrb.gmra.mxu2 %vm1371_vm4, %v1773_v13 }
 0x212   : > { %v1770_v31 = vpop.f32.mrf.mxu3 }
 0x213   : > { %2390 = vmatpush.msk.msrb.mxu3 %vm1375_vm2, %v1770_v31  ;;  %v2481_v31 = vld [vmem:[%s2543_s26 + $0x50] sm:$0xff] }
 0x214   : > { %2391 = vmatmul.msk.f32.vlgmr.msrb.gmra.mxu3 %vm1371_vm4, %v1773_v13  ;;  %v2478_v13 = vld [vmem:[%s2543_s26 + $0x38] sm:$0xff] }
 0x244   : > { %v1803_v38 = vpop.f32.mrf.mxu0 }
 0x245   : > { %v1826_v2 = vpop.f32.mrf.mxu1  ;;  %v1804_v24 = vadd.f32 %v1803_v38, %v2942_v26 }
 0x246   : > { %v1827_v21 = vadd.f32 %v1826_v2, %v2942_v26 }
 0x247   : > { %v2151_v28 = vadd.f32 %v2469_v44, %v1804_v24 }
 0x248   : > { %v2152_v36 = vadd.f32 %v2470_v45, %v1827_v21  ;;  %v2484_v45 = vld [vmem:[%s2543_s26 + $0x78] sm:$0xff] }
 0x249   : > { %v2167_v54 = vmax.f32 %v2151_v28, 0.0 }
 0x24a   : > { %v2168_v55 = vmax.f32 %v2152_v36, 0.0 }
 0x24b   : > { %2183 = vst.msk [vmem:[%s2959_s14] sm:$0xff] %vm635_vm1, %v2167_v54 }
 0x24c   : > { %2184 = vst.msk [vmem:[%s2959_s14 + $0x8] sm:$0xff] %vm635_vm1, %v2168_v55 }
 0x254   : > { %v1895_v39 = vpop.f32.mrf.mxu0 }
 0x255   : > { %v1918_v41 = vpop.f32.mrf.mxu1  ;;  %v1896_v42 = vadd.f32 %v1895_v39, %v2942_v26 }
 0x256   : > { %v1919_v43 = vadd.f32 %v1918_v41, %v2942_v26 }
 0x257   : > { %v2155_v51 = vadd.f32 %v2473_v50, %v1896_v42 }
 0x258   : > { %v2156_v53 = vadd.f32 %v2474_v52, %v1919_v43 }
 0x259   : > { %v2171_v61 = vmax.f32 %v2155_v51, 0.0 }
 0x25a   : > { %v2172_v62 = vmax.f32 %v2156_v53, 0.0 }
 0x25b   : > { %2187 = vst.msk [vmem:[%s2959_s14 + $0x20] sm:$0xff] %vm635_vm1, %v2171_v61 }
 0x25c   : > { %2188 = vst.msk [vmem:[%s2959_s14 + $0x28] sm:$0xff] %vm635_vm1, %v2172_v62 }
 0x25d   : > { %v1849_v4 = vpop.f32.mrf.mxu2 }
 0x25e   : > { %v1872_v40 = vpop.f32.mrf.mxu3  ;;  %v1850_v27 = vadd.f32 %v1849_v4, %v2942_v26 }
 0x25f   : > { %v1873_v18 = vadd.f32 %v1872_v40, %v2942_v26  ;;  %v2482_v40 = vld [vmem:[%s2543_s26 + $0x58] sm:$0xff] }
 0x260   : > { %v2153_v60 = vadd.f32 %v2471_v15, %v1850_v27 }
 0x261   : > { %v2154_v49 = vadd.f32 %v2472_v46, %v1873_v18  ;;  %v2483_v18 = vld [vmem:[%s2543_s26 + $0x70] sm:$0xff] }
 0x262   : > { %v2169_v56 = vmax.f32 %v2153_v60, 0.0 }
 0x263   : > { %v2170_v23 = vmax.f32 %v2154_v49, 0.0 }
 0x264   : > { %2185 = vst.msk [vmem:[%s2959_s14 + $0x10] sm:$0xff] %vm635_vm1, %v2169_v56 }
 0x265   : > { %2186 = vst.msk [vmem:[%s2959_s14 + $0x18] sm:$0xff] %vm635_vm1, %v2170_v23 }
 0x267   : > { %v1987_v63 = vpop.f32.mrf.mxu0 }
 0x268   : > { %v1988_v0 = vadd.f32 %v1987_v63, %v2942_v26 }
 0x26a   : > { %v2159_v47 = vadd.f32 %v2475_v1, %v1988_v0  ;;  %v2010_v58 = vpop.f32.mrf.mxu1 }
 0x26b   : > { %v2011_v6 = vadd.f32 %v2010_v58, %v2942_v26 }
 0x26c   : > { %v2175_v5 = vmax.f32 %v2159_v47, 0.0 }
 0x26d   : > { %v1941_v25 = vpop.f32.mrf.mxu2  ;;  %v2160_v14 = vadd.f32 %v2476_v7, %v2011_v6 }
 0x26e   : > { %v1942_v34 = vadd.f32 %v1941_v25, %v2942_v26  ;;  %2191 = vst.msk [vmem:[%s2959_s14 + $0x40] sm:$0xff] %vm635_vm1, %v2175_v5 }
 0x26f   : > { %v2176_v32 = vmax.f32 %v2160_v14, 0.0 }
 0x270   : > { %v2157_v29 = vadd.f32 %v2477_v8, %v1942_v34  ;;  %v1964_v9 = vpop.f32.mrf.mxu3 }
 0x271   : > { %v1965_v10 = vadd.f32 %v1964_v9, %v2942_v26  ;;  %2192 = vst.msk [vmem:[%s2959_s14 + $0x48] sm:$0xff] %vm635_vm1, %v2176_v32 }
 0x272   : > { %v2173_v48 = vmax.f32 %v2157_v29, 0.0 }
 0x273   : > { %v2158_v16 = vadd.f32 %v2478_v13, %v1965_v10 }
 0x274   : > { %2189 = vst.msk [vmem:[%s2959_s14 + $0x30] sm:$0xff] %vm635_vm1, %v2173_v48 }
 0x275   : > { %v2174_v35 = vmax.f32 %v2158_v16, 0.0 }
 0x277   : > { %2190 = vst.msk [vmem:[%s2959_s14 + $0x38] sm:$0xff] %vm635_vm1, %v2174_v35 }
 0x27c   : > { %v2079_v33 = vpop.f32.mrf.mxu0 }
 0x27d   : > { %v2080_v37 = vadd.f32 %v2079_v33, %v2942_v26 }
 0x27f   : > { %v2163_v19 = vadd.f32 %v2479_v17, %v2080_v37  ;;  %v2102_v11 = vpop.f32.mrf.mxu1 }
 0x280   : > { %v2103_v20 = vadd.f32 %v2102_v11, %v2942_v26 }
 0x281   : > { %v2179_v22 = vmax.f32 %v2163_v19, 0.0 }
 0x282   : > { %v2033_v3 = vpop.f32.mrf.mxu2  ;;  %v2164_v57 = vadd.f32 %v2480_v12, %v2103_v20 }
 0x283   : > { %v2034_v59 = vadd.f32 %v2033_v3, %v2942_v26  ;;  %2195 = vst.msk [vmem:[%s2959_s14 + $0x60] sm:$0xff] %vm635_vm1, %v2179_v22 }
 0x284   : > { %v2180_v30 = vmax.f32 %v2164_v57, 0.0 }
 0x285   : > { %v2161_v38 = vadd.f32 %v2481_v31, %v2034_v59  ;;  %v2056_v2 = vpop.f32.mrf.mxu3 }
 0x286   : > { %v2057_v4 = vadd.f32 %v2056_v2, %v2942_v26  ;;  %2196 = vst.msk [vmem:[%s2959_s14 + $0x68] sm:$0xff] %vm635_vm1, %v2180_v30 }
 0x287   : > { %v2177_v39 = vmax.f32 %v2161_v38, 0.0 }
 0x288   : > { %v2162_v41 = vadd.f32 %v2482_v40, %v2057_v4 }
 0x289   : > { %2193 = vst.msk [vmem:[%s2959_s14 + $0x50] sm:$0xff] %vm635_vm1, %v2177_v39 }
 0x28a   : > { %v2178_v24 = vmax.f32 %v2162_v41, 0.0 }
 0x28c   : > { %2194 = vst.msk [vmem:[%s2959_s14 + $0x58] sm:$0xff] %vm635_vm1, %v2178_v24 }
 0x294   : > { %v2125_v21 = vpop.f32.mrf.mxu2 }
 0x295   : > { %v2126_v27 = vadd.f32 %v2125_v21, %v2942_v26 }
 0x297   : > { %v2165_v42 = vadd.f32 %v2483_v18, %v2126_v27  ;;  %v2148_v43 = vpop.f32.mrf.mxu3 }
 0x298   : > { %v2149_v44 = vadd.f32 %v2148_v43, %v2942_v26 }
 0x299   : > { %v2181_v28 = vmax.f32 %v2165_v42, 0.0 }
 0x29a   : > { %v2166_v36 = vadd.f32 %v2484_v45, %v2149_v44 }
 0x29b   : > { %2197 = vst.msk [vmem:[%s2959_s14 + $0x70] sm:$0xff] %vm635_vm1, %v2181_v28 }
 0x29c   : > { %v2182_v15 = vmax.f32 %v2166_v36, 0.0 }
 0x29e   : > { %2198 = vst.msk [vmem:[%s2959_s14 + $0x78] sm:$0xff] %vm635_vm1, %v2182_v15 }
 0x29f PF: > { %s15_s18 = sadd.s32 1, %s2491_s18  }
 0x2a0   : > { %p12_p4 = scmp.ge.s32.totalorder %s15_s18, 4  }
 0x2a2   :  { %14 = sbr.rel (!%p12_p4) target bundleno = 1 (0x1), region = 70 }

// kernel: _lambda_.3
= control target key start
LH: loop header
LB: loop body
LE: loop exit
PB: predicated region body
PF: predicated region fallthrough
CT: control target
= control target key end

     0   :  { %s438_s12 = smov 0   ;;  %s440_s13 = smov 0   ;;  %s477_s0 = inlined_call_operand.vmem [shape: f32[2,8,256], index: 0, kind: input, shape index: {}]   ;;  %s478_s1 = inlined_call_operand.vmem [shape: f32[8,8], index: 1, kind: input, shape index: {}]   ;;  %s479_s2 = inlined_call_operand.vmem [shape: f32[8,1], index: 2, kind: input, shape index: {}]   ;;  %s480_s3 = inlined_call_operand.vmem [shape: f32[2,8,256], index: 3, kind: output, shape index: {}]  }
   0x1   :  { %s442_s14 = smov 0  }
   0x2 LB: > { %s25_s15 = sadd.s32 1, %s411_s13  ;;  %p356_p0 = scmp.ge.s32.totalorder %s415_s14, 1  ;;  %s415_s14 = sphi %s442_s14, %s13_s14   ;;  %s411_s13 = sphi %s440_s13, %s482_s13   ;;  %s407_s12 = sphi %s438_s12, %s481_s12  }
   0x3   : > { %p27_p1 = scmp.ge.s32.totalorder %s25_s15, 2  ;;  %p158_p2 = scmp.lt.s32.totalorder %s415_s14, 3 }
   0x5   : > { %s484_s15 = smov (%p27_p1, %s25_s15), 0  ;;  %p159_p3 = pnand %p356_p0, %p158_p2 }
   0x6   : > { %p191_p4 = scmp.lt.s32.totalorder (!%p159_p3), %s407_s12, 1 }
   0x7   : > { %162 = sbr.rel (%p159_p3) target bundleno = 147 (0x93), region = 32 }
   0xc   : > { %v213_v0 = vld [vmem:[%s479_s2] sm:$0xff]  ;;  %v417_v1 = vmov 0   ;;  %s486_s12 = smov (!%p191_p4, %s407_s12), 1  ;;  %vm219_vm0 = vcmask 64512  }
   0xd   : > { %392 = vset.pattern.permute.xlu0 %v417_v1  ;;  %s365_s18 = sshll.u32 %s486_s12, 4  ;;  %v212_v2 = vld [vmem:[%s478_s1] sm:$0xff] }
   0xe   : > { %216 = vperm.xlu0 %392, %v213_v0   ;;  %s198_s21 = scalar_lea.vmem %s477_s0, %s365_s18  ;;  %s208_s26 = scalar_lea.vmem %s480_s3, %s365_s18 }
   0xf   : > { %v210_v3 = vld [vmem:[%s198_s21] sm:$0xff]  ;;  %v211_v4 = vld [vmem:[%s198_s21 + $0x8] sm:$0xff] }
  0x10   : > { %238 = vmatpush.msra.mxu0 %v210_v3  ;;  %258 = vmatpush.msra.mxu1 %v211_v4 }
  0x11   : > { %361 = vmatmul.msk.f32.vlgmr.msra.gmra.mxu0 %vm219_vm0, %v212_v2  ;;  %362 = vmatmul.msk.f32.vlgmr.msra.gmra.mxu1 %vm219_vm0, %v212_v2 }
  0x80   : > { %v217_v5 = vpop.permute.xlu0 %216 }
  0x8e   : > { %v240_v6 = vpop.f32.mrf.mxu0  ;;  %v260_v7 = vpop.f32.mrf.mxu1 }
  0x8f   : > { %v241_v8 = vadd.f32 %v240_v6, %v217_v5  ;;  %v261_v9 = vadd.f32 %v260_v7, %v217_v5 }
  0x91   : > { %263 = vst [vmem:[%s208_s26] sm:$0xff] %v241_v8 }
  0x92   : > { %264 = vst [vmem:[%s208_s26 + $0x8] sm:$0xff] %v261_v9 }
  0x93 PF: > { %s13_s14 = sadd.s32 1, %s415_s14   ;;  %s481_s12 = smov %s411_s13 }
  0x94   : > { %p10_p5 = scmp.ge.s32.totalorder %s13_s14, 4   ;;  %s482_s13 = smov %s484_s15 }
  0x96   :  { %12 = sbr.rel (!%p10_p5) target bundleno = 2 (0x2), region = 62 }

</bundles_post_ra>
